<compile_context>
chip_gen: v5e
topology: v5e:2x2
jax: 0.10.0
libtpu: 0.0.40
codegen_flags: <defaults>
</compile_context>

<pallas_src>
import math

import numpy as np

import jax
import jax.numpy as jnp
from jax import lax
from jax.experimental import pallas as pl
from jax.experimental.pallas import tpu as pltpu


# --------------------------------------------------------------------------
# Hardware sizing helpers
# --------------------------------------------------------------------------
def _vmem_capacity_bytes():
    """Physical VMEM per TensorCore (128 MiB on v5e/v6e, 64 MiB on v7x)."""
    try:
        info = pltpu.get_tpu_info()
        for name in ("vmem_capacity_bytes", "vmem_size_bytes", "vmem_bytes"):
            v = getattr(info, name, None)
            if v:
                return int(v)
    except Exception:
        pass
    return 64 * 1024 * 1024  # conservative (v7x-sized) fallback


def _vmem_limit_for(vmem_cap, bytes_per_step):
    """Scoped-VMEM limit: half the part by default, raised if a single
    double-buffered step would not fit."""
    limit = vmem_cap // 2
    needed = 2 * bytes_per_step  # double-buffered inputs+outputs
    if needed > limit:
        # TODO(synk): tile the spatial axis (second grid dim + scratch
        # accumulation) for very large H*W instead of only raising the limit.
        limit = min(int(vmem_cap * 0.9), 2 * needed)
    return int(limit)


def _pick_sublane_tile(bc, hw, itemsize, per_buffer_budget):
    """Tile for the B*C axis when it sits on sublanes (avg / matmul kernel)."""
    if bc < 8:
        return bc                                   # full-dim (tiny) block
    by_budget_rows = max(8, per_buffer_budget // max(1, hw * itemsize))
    t = 8
    for cand in (2048, 1024, 512, 256, 128, 64, 32, 16, 8):
        if cand <= by_budget_rows and cand <= bc:
            t = cand
            break
    # Guarantee >=2 grid steps when there is enough work (v7x megacore).
    while t >= 16 and pl.cdiv(bc, t) < 2:
        t //= 2
    return t


def _pick_lane_tile(bc, hw, w, n_out, itemsize, per_buffer_budget):
    """Tile for the B*C axis when it sits on lanes (max kernel)."""
    if bc <= 128:
        return bc                                   # full-dim (lane-masked) block
    # Bound live vreg footprint: (W accumulator rows + n_out result rows) * T.
    live_row_bytes = (w + n_out) * max(4, itemsize)
    by_regs = max(128, ((128 * 1024) // live_row_bytes) // 128 * 128)
    by_budget = max(128, (per_buffer_budget // max(1, hw * itemsize)) // 128 * 128)
    t = 128
    for cand in (1024, 512, 256, 128):
        if cand <= by_regs and cand <= by_budget and cand <= bc:
            t = cand
            break
    # Guarantee >=2 grid steps when there is enough work (v7x megacore).
    while t >= 256 and pl.cdiv(bc, t) < 2:
        t //= 2
    return t


# --------------------------------------------------------------------------
# Window geometry (identical to F.pad(centered zeros) + pooling with
# kernel = stride = ceil(dim / level))
# --------------------------------------------------------------------------
def _level_geometry(level, H, W):
    h_k = int(math.ceil(H / level))
    w_k = int(math.ceil(W / level))
    h_pad1 = (h_k * level - H) // 2
    w_pad1 = (w_k * level - W) // 2
    return h_k, w_k, h_pad1, w_pad1


def _build_avg_matrix(levels, H, W):
    """Constant (H*W, n_out) pooling matrix: 1/kernel_area at in-window
    positions, 0 elsewhere.  Zero padding contributes nothing to the sum and
    the divisor is the full kernel area, matching F.pad + AvgPool2d."""
    n_out = sum(int(L) * int(L) for L in levels)
    P = np.zeros((H * W, n_out), dtype=np.float32)
    col = 0
    for L in levels:
        h_k, w_k, h_pad1, w_pad1 = _level_geometry(L, H, W)
        inv_area = 1.0 / float(h_k * w_k)
        for li in range(L):
            h0 = max(0, li * h_k - h_pad1)
            h1 = min(H, (li + 1) * h_k - h_pad1)
            for lj in range(L):
                w0 = max(0, lj * w_k - w_pad1)
                w1 = min(W, (lj + 1) * w_k - w_pad1)
                for h in range(h0, h1):
                    P[h * W + w0:h * W + w1, col] = inv_area
                col += 1
    return jnp.asarray(P)


# --------------------------------------------------------------------------
# Kernels
# --------------------------------------------------------------------------
def _avg_kernel(x_ref, p_ref, o_ref):
    # x_ref: (bc_tile, H*W) natural layout; p_ref: (H*W, n_out) constant
    # pooling matrix (VMEM-resident); o_ref: (bc_tile, n_out).
    # All reduction work runs on the otherwise-idle MXU; single dense store.
    o_ref[...] = jnp.dot(
        x_ref[...].astype(jnp.float32), p_ref[...],
        preferred_element_type=jnp.float32,
    ).astype(o_ref.dtype)


def _make_max_kernel(levels, H, W):
    n_out = sum(int(L) * int(L) for L in levels)

    def kernel(x_ref, o_ref):
        # x_ref: (H*W, T)  -- spatial (h-major) on sublanes, B*C tile on lanes.
        # o_ref: (n_out, T)
        T = x_ref.shape[1]
        dt = x_ref.dtype
        if jnp.issubdtype(dt, jnp.floating):
            neg = jnp.asarray(jnp.finfo(dt).min, dt)
        else:
            neg = jnp.asarray(jnp.iinfo(dt).min, dt)
        zero_row = jnp.zeros((1, T), dt)
        # Static sublane index of each w within one h-row group; shared by all
        # windows of all levels (lane-dense VPU select, no unaligned slices).
        w_iota = lax.broadcasted_iota(jnp.int32, (W, T), 0)

        rows = []
        for L in levels:
            h_k, w_k, h_pad1, w_pad1 = _level_geometry(L, H, W)
            area = h_k * w_k
            for li in range(L):
                h0 = max(0, li * h_k - h_pad1)
                h1 = min(H, (li + 1) * h_k - h_pad1)
                if h1 <= h0:
                    # Entire row of windows lies inside the zero padding.
                    rows.extend([zero_row] * L)
                    continue
                # Per-w running max over the h extent of this window row:
                # one aligned (W, T) load per h, shared across all lj windows.
                # Live accumulator is only W sublane rows wide (no spills).
                acc = x_ref[h0 * W:(h0 + 1) * W, :]
                for h in range(h0 + 1, h1):
                    acc = jnp.maximum(acc, x_ref[h * W:(h + 1) * W, :])
                for lj in range(L):
                    w0 = max(0, lj * w_k - w_pad1)
                    w1 = min(W, (lj + 1) * w_k - w_pad1)
                    if w1 <= w0:
                        rows.append(zero_row)
                        continue
                    sel = (w_iota >= w0) & (w_iota < w1)
                    v = jnp.max(jnp.where(sel, acc, neg), axis=0, keepdims=True)
                    if (h1 - h0) * (w1 - w0) < area:
                        # Window overlaps the centered zero padding; the zeros
                        # participate in the max (F.pad + MaxPool2d).
                        v = jnp.maximum(v, jnp.zeros((), dt))
                    rows.append(v)
        assert len(rows) == n_out
        # Single dense (n_out, T) store instead of n_out masked row stores.
        o_ref[...] = jnp.concatenate(rows, axis=0).astype(o_ref.dtype)

    return kernel


# --------------------------------------------------------------------------
# Public wrapper
# --------------------------------------------------------------------------
def pyramid_pooling(x, levels, mode="max"):
    """JAX/Pallas equivalent of PyramidPooling.forward (spatial_pyramid_pool).

    x: (B, C, H, W) array (NCHW, like PyTorch).
    Returns: (B, sum(C * level * level for level in levels))
    """
    if mode not in ("max", "avg"):
        raise RuntimeError('Unknown pooling type: %s, please use "max" or "avg".' % mode)

    B, C, H, W = x.shape
    BC = B * C
    HW = H * W
    n_out = sum(int(L) * int(L) for L in levels)
    itemsize = jnp.dtype(x.dtype).itemsize

    vmem_cap = _vmem_capacity_bytes()
    per_buffer_budget = vmem_cap // 8        # ~16 MiB on v5e/v6e, ~8 MiB on v7x

    if mode == "avg":
        # Natural layout, zero host-side relayout: reshape (B,C,H,W)->(BC,HW)
        # is a free metadata-only reshape.  The whole pyramid is one matmul.
        bc_tile = _pick_sublane_tile(BC, HW, itemsize, per_buffer_budget)
        x2 = x.reshape(BC, HW)
        P = _build_avg_matrix(levels, H, W)

        step_bytes = (bc_tile * HW + bc_tile * n_out) * itemsize + HW * n_out * 4
        vmem_limit = _vmem_limit_for(vmem_cap, step_bytes)

        slab = pl.pallas_call(
            _avg_kernel,
            out_shape=jax.ShapeDtypeStruct((BC, n_out), x.dtype),
            grid=(pl.cdiv(BC, bc_tile),),
            in_specs=[
                pl.BlockSpec((bc_tile, HW), lambda i: (i, 0)),
                pl.BlockSpec((HW, n_out), lambda i: (0, 0)),   # VMEM-resident P
            ],
            out_specs=pl.BlockSpec((bc_tile, n_out), lambda i: (i, 0)),
            compiler_params=pltpu.CompilerParams(
                dimension_semantics=("parallel",),
                vmem_limit_bytes=vmem_limit,
            ),
        )(x2, P)
        # slab: (BC, n_out), rows = b*C + c, cols = per level (li, lj)-major.
        pieces = []
        off = 0
        for L in levels:
            pieces.append(slab[:, off:off + L * L].reshape(B, C * L * L))
            off += L * L
        return jnp.concatenate(pieces, axis=1)

    # --- max mode ---------------------------------------------------------
    # TODO(synk): the (BC, HW) -> (HW, BC) transpose is one extra HBM pass;
    # accepted knowingly (review option B) to keep every window reduction a
    # pure per-lane VPU max.  A follow-up could fuse it in-kernel via
    # pltpu.einshape into VMEM scratch.
    lane_tile = _pick_lane_tile(BC, HW, W, n_out, itemsize, per_buffer_budget)
    x2 = x.reshape(BC, HW).T                       # (HW, BC); no jnp.pad needed

    step_bytes = (HW * lane_tile + n_out * lane_tile) * itemsize
    vmem_limit = _vmem_limit_for(vmem_cap, step_bytes)

    kernel = _make_max_kernel(levels, H, W)
    slab = pl.pallas_call(
        kernel,
        out_shape=jax.ShapeDtypeStruct((n_out, BC), x.dtype),
        grid=(pl.cdiv(BC, lane_tile),),
        in_specs=[pl.BlockSpec((HW, lane_tile), lambda i: (0, i))],
        out_specs=pl.BlockSpec((n_out, lane_tile), lambda i: (0, i)),
        compiler_params=pltpu.CompilerParams(
            dimension_semantics=("parallel",),
            vmem_limit_bytes=vmem_limit,
        ),
    )(x2)
    # slab: (n_out, BC); ragged last lane block (if any) was discarded on write.
    pieces = []
    off = 0
    for L in levels:
        blk = slab[off:off + L * L, :]             # (L*L, BC)
        off += L * L
        pieces.append(blk.T.reshape(B, C * L * L))
    return jnp.concatenate(pieces, axis=1)


# --------------------------------------------------------------------------
# Pure-jnp reference (mirrors the PyTorch semantics) for verification
# --------------------------------------------------------------------------
def _reference_pyramid_pooling(x, levels, mode="max"):
    B, C, H, W = x.shape
    pieces = []
    for level in levels:
        h_kernel = int(math.ceil(H / level))
        w_kernel = int(math.ceil(W / level))
        w_total = w_kernel * level - W
        h_total = h_kernel * level - H
        w_pad1, w_pad2 = w_total // 2, w_total - w_total // 2
        h_pad1, h_pad2 = h_total // 2, h_total - h_total // 2
        xp = jnp.pad(x, ((0, 0), (0, 0), (h_pad1, h_pad2), (w_pad1, w_pad2)))
        xr = xp.reshape(B, C, level, h_kernel, level, w_kernel)
        if mode == "max":
            pooled = jnp.max(xr, axis=(3, 5))
        else:
            pooled = jnp.mean(xr, axis=(3, 5))
        pieces.append(pooled.reshape(B, -1))
    return jnp.concatenate(pieces, axis=1)


if __name__ == "__main__":
    key = jax.random.PRNGKey(0)
    B, C, H, W = 2, 4, 16, 16
    levels = [1, 2, 3, 4]  # level 3 exercises the centered zero-padding path

    x = jax.random.normal(key, (B, C, H, W), dtype=jnp.float32)

    for mode in ("max", "avg"):
        out = jax.block_until_ready(pyramid_pooling(x, levels, mode))
        ref = _reference_pyramid_pooling(x, levels, mode)
        expected_n = sum(C * L * L for L in levels)
        assert out.shape == (B, expected_n), (out.shape, (B, expected_n))
        assert jnp.allclose(out, ref, atol=1e-5, rtol=1e-5), f"mismatch vs reference ({mode})"

    print("KERNEL_OK")
</pallas_src>

<mosaic_0001>
module attributes {stable_mosaic.version = 11 : i64} {
  func.func @kernel(%arg0: i32, %arg1: memref<256x8xf32, #tpu.memory_space<vmem>>, %arg2: memref<30x8xf32, #tpu.memory_space<vmem>>) attributes {dimension_semantics = [#tpu.dimension_semantics<parallel>], iteration_bounds = array<i64: 1>, scalar_prefetch = 0 : i64, scratch_operands = 0 : i64, tpu.core_type = #tpu.core_type<tc>, window_params = [{transform_indices = @transform_0, window_bounds = array<i64: 256, 8>}, {transform_indices = @transform_1, window_bounds = array<i64: 30, 8>}]} {
    %0 = tpu.iota {dimensions = array<i32: 0>} : vector<16x8xi32>
    %c0 = arith.constant 0 : index
    %c0_0 = arith.constant 0 : index
    %1 = vector.load %arg1[%c0, %c0_0] : memref<256x8xf32, #tpu.memory_space<vmem>>, vector<16x8xf32>
    %c16 = arith.constant 16 : index
    %c0_1 = arith.constant 0 : index
    %2 = vector.load %arg1[%c16, %c0_1] : memref<256x8xf32, #tpu.memory_space<vmem>>, vector<16x8xf32>
    %3 = arith.maximumf %1, %2 : vector<16x8xf32>
    %c32 = arith.constant 32 : index
    %c0_2 = arith.constant 0 : index
    %4 = vector.load %arg1[%c32, %c0_2] : memref<256x8xf32, #tpu.memory_space<vmem>>, vector<16x8xf32>
    %5 = arith.maximumf %3, %4 : vector<16x8xf32>
    %c48 = arith.constant 48 : index
    %c0_3 = arith.constant 0 : index
    %6 = vector.load %arg1[%c48, %c0_3] : memref<256x8xf32, #tpu.memory_space<vmem>>, vector<16x8xf32>
    %7 = arith.maximumf %5, %6 : vector<16x8xf32>
    %c64 = arith.constant 64 : index
    %c0_4 = arith.constant 0 : index
    %8 = vector.load %arg1[%c64, %c0_4] : memref<256x8xf32, #tpu.memory_space<vmem>>, vector<16x8xf32>
    %9 = arith.maximumf %7, %8 : vector<16x8xf32>
    %c80 = arith.constant 80 : index
    %c0_5 = arith.constant 0 : index
    %10 = vector.load %arg1[%c80, %c0_5] : memref<256x8xf32, #tpu.memory_space<vmem>>, vector<16x8xf32>
    %11 = arith.maximumf %9, %10 : vector<16x8xf32>
    %c96 = arith.constant 96 : index
    %c0_6 = arith.constant 0 : index
    %12 = vector.load %arg1[%c96, %c0_6] : memref<256x8xf32, #tpu.memory_space<vmem>>, vector<16x8xf32>
    %13 = arith.maximumf %11, %12 : vector<16x8xf32>
    %c112 = arith.constant 112 : index
    %c0_7 = arith.constant 0 : index
    %14 = vector.load %arg1[%c112, %c0_7] : memref<256x8xf32, #tpu.memory_space<vmem>>, vector<16x8xf32>
    %15 = arith.maximumf %13, %14 : vector<16x8xf32>
    %c128 = arith.constant 128 : index
    %c0_8 = arith.constant 0 : index
    %16 = vector.load %arg1[%c128, %c0_8] : memref<256x8xf32, #tpu.memory_space<vmem>>, vector<16x8xf32>
    %17 = arith.maximumf %15, %16 : vector<16x8xf32>
    %c144 = arith.constant 144 : index
    %c0_9 = arith.constant 0 : index
    %18 = vector.load %arg1[%c144, %c0_9] : memref<256x8xf32, #tpu.memory_space<vmem>>, vector<16x8xf32>
    %19 = arith.maximumf %17, %18 : vector<16x8xf32>
    %c160 = arith.constant 160 : index
    %c0_10 = arith.constant 0 : index
    %20 = vector.load %arg1[%c160, %c0_10] : memref<256x8xf32, #tpu.memory_space<vmem>>, vector<16x8xf32>
    %21 = arith.maximumf %19, %20 : vector<16x8xf32>
    %c176 = arith.constant 176 : index
    %c0_11 = arith.constant 0 : index
    %22 = vector.load %arg1[%c176, %c0_11] : memref<256x8xf32, #tpu.memory_space<vmem>>, vector<16x8xf32>
    %23 = arith.maximumf %21, %22 : vector<16x8xf32>
    %c192 = arith.constant 192 : index
    %c0_12 = arith.constant 0 : index
    %24 = vector.load %arg1[%c192, %c0_12] : memref<256x8xf32, #tpu.memory_space<vmem>>, vector<16x8xf32>
    %25 = arith.maximumf %23, %24 : vector<16x8xf32>
    %c208 = arith.constant 208 : index
    %c0_13 = arith.constant 0 : index
    %26 = vector.load %arg1[%c208, %c0_13] : memref<256x8xf32, #tpu.memory_space<vmem>>, vector<16x8xf32>
    %27 = arith.maximumf %25, %26 : vector<16x8xf32>
    %c224 = arith.constant 224 : index
    %c0_14 = arith.constant 0 : index
    %28 = vector.load %arg1[%c224, %c0_14] : memref<256x8xf32, #tpu.memory_space<vmem>>, vector<16x8xf32>
    %29 = arith.maximumf %27, %28 : vector<16x8xf32>
    %c240 = arith.constant 240 : index
    %c0_15 = arith.constant 0 : index
    %30 = vector.load %arg1[%c240, %c0_15] : memref<256x8xf32, #tpu.memory_space<vmem>>, vector<16x8xf32>
    %31 = arith.maximumf %29, %30 : vector<16x8xf32>
    %c0_i32 = arith.constant 0 : i32
    %32 = vector.broadcast %c0_i32 : i32 to vector<16x8xi32>
    %33 = arith.cmpi sge, %0, %32 : vector<16x8xi32>
    %c16_i32 = arith.constant 16 : i32
    %34 = vector.broadcast %c16_i32 : i32 to vector<16x8xi32>
    %35 = arith.cmpi slt, %0, %34 : vector<16x8xi32>
    %36 = arith.andi %33, %35 : vector<16x8xi1>
    %cst = arith.constant -3.40282347E+38 : f32
    %37 = vector.broadcast %cst : f32 to vector<16x8xf32>
    %38 = arith.select %36, %31, %37 : vector<16x8xi1>, vector<16x8xf32>
    %cst_16 = arith.constant dense<0xFF800000> : vector<8xf32>
    %39 = vector.multi_reduction <maximumf>, %38, %cst_16 [0] : vector<16x8xf32> to vector<8xf32>
    %40 = vector.shape_cast %39 : vector<8xf32> to vector<1x8xf32>
    %c0_17 = arith.constant 0 : index
    %c0_18 = arith.constant 0 : index
    %41 = vector.load %arg1[%c0_17, %c0_18] : memref<256x8xf32, #tpu.memory_space<vmem>>, vector<16x8xf32>
    %c16_19 = arith.constant 16 : index
    %c0_20 = arith.constant 0 : index
    %42 = vector.load %arg1[%c16_19, %c0_20] : memref<256x8xf32, #tpu.memory_space<vmem>>, vector<16x8xf32>
    %43 = arith.maximumf %41, %42 : vector<16x8xf32>
    %c32_21 = arith.constant 32 : index
    %c0_22 = arith.constant 0 : index
    %44 = vector.load %arg1[%c32_21, %c0_22] : memref<256x8xf32, #tpu.memory_space<vmem>>, vector<16x8xf32>
    %45 = arith.maximumf %43, %44 : vector<16x8xf32>
    %c48_23 = arith.constant 48 : index
    %c0_24 = arith.constant 0 : index
    %46 = vector.load %arg1[%c48_23, %c0_24] : memref<256x8xf32, #tpu.memory_space<vmem>>, vector<16x8xf32>
    %47 = arith.maximumf %45, %46 : vector<16x8xf32>
    %c64_25 = arith.constant 64 : index
    %c0_26 = arith.constant 0 : index
    %48 = vector.load %arg1[%c64_25, %c0_26] : memref<256x8xf32, #tpu.memory_space<vmem>>, vector<16x8xf32>
    %49 = arith.maximumf %47, %48 : vector<16x8xf32>
    %c80_27 = arith.constant 80 : index
    %c0_28 = arith.constant 0 : index
    %50 = vector.load %arg1[%c80_27, %c0_28] : memref<256x8xf32, #tpu.memory_space<vmem>>, vector<16x8xf32>
    %51 = arith.maximumf %49, %50 : vector<16x8xf32>
    %c96_29 = arith.constant 96 : index
    %c0_30 = arith.constant 0 : index
    %52 = vector.load %arg1[%c96_29, %c0_30] : memref<256x8xf32, #tpu.memory_space<vmem>>, vector<16x8xf32>
    %53 = arith.maximumf %51, %52 : vector<16x8xf32>
    %c112_31 = arith.constant 112 : index
    %c0_32 = arith.constant 0 : index
    %54 = vector.load %arg1[%c112_31, %c0_32] : memref<256x8xf32, #tpu.memory_space<vmem>>, vector<16x8xf32>
    %55 = arith.maximumf %53, %54 : vector<16x8xf32>
    %c0_i32_33 = arith.constant 0 : i32
    %56 = vector.broadcast %c0_i32_33 : i32 to vector<16x8xi32>
    %57 = arith.cmpi sge, %0, %56 : vector<16x8xi32>
    %c8_i32 = arith.constant 8 : i32
    %58 = vector.broadcast %c8_i32 : i32 to vector<16x8xi32>
    %59 = arith.cmpi slt, %0, %58 : vector<16x8xi32>
    %60 = arith.andi %57, %59 : vector<16x8xi1>
    %cst_34 = arith.constant -3.40282347E+38 : f32
    %61 = vector.broadcast %cst_34 : f32 to vector<16x8xf32>
    %62 = arith.select %60, %55, %61 : vector<16x8xi1>, vector<16x8xf32>
    %cst_35 = arith.constant dense<0xFF800000> : vector<8xf32>
    %63 = vector.multi_reduction <maximumf>, %62, %cst_35 [0] : vector<16x8xf32> to vector<8xf32>
    %64 = vector.shape_cast %63 : vector<8xf32> to vector<1x8xf32>
    %c8_i32_36 = arith.constant 8 : i32
    %65 = vector.broadcast %c8_i32_36 : i32 to vector<16x8xi32>
    %66 = arith.cmpi sge, %0, %65 : vector<16x8xi32>
    %c16_i32_37 = arith.constant 16 : i32
    %67 = vector.broadcast %c16_i32_37 : i32 to vector<16x8xi32>
    %68 = arith.cmpi slt, %0, %67 : vector<16x8xi32>
    %69 = arith.andi %66, %68 : vector<16x8xi1>
    %cst_38 = arith.constant -3.40282347E+38 : f32
    %70 = vector.broadcast %cst_38 : f32 to vector<16x8xf32>
    %71 = arith.select %69, %55, %70 : vector<16x8xi1>, vector<16x8xf32>
    %cst_39 = arith.constant dense<0xFF800000> : vector<8xf32>
    %72 = vector.multi_reduction <maximumf>, %71, %cst_39 [0] : vector<16x8xf32> to vector<8xf32>
    %73 = vector.shape_cast %72 : vector<8xf32> to vector<1x8xf32>
    %c128_40 = arith.constant 128 : index
    %c0_41 = arith.constant 0 : index
    %74 = vector.load %arg1[%c128_40, %c0_41] : memref<256x8xf32, #tpu.memory_space<vmem>>, vector<16x8xf32>
    %c144_42 = arith.constant 144 : index
    %c0_43 = arith.constant 0 : index
    %75 = vector.load %arg1[%c144_42, %c0_43] : memref<256x8xf32, #tpu.memory_space<vmem>>, vector<16x8xf32>
    %76 = arith.maximumf %74, %75 : vector<16x8xf32>
    %c160_44 = arith.constant 160 : index
    %c0_45 = arith.constant 0 : index
    %77 = vector.load %arg1[%c160_44, %c0_45] : memref<256x8xf32, #tpu.memory_space<vmem>>, vector<16x8xf32>
    %78 = arith.maximumf %76, %77 : vector<16x8xf32>
    %c176_46 = arith.constant 176 : index
    %c0_47 = arith.constant 0 : index
    %79 = vector.load %arg1[%c176_46, %c0_47] : memref<256x8xf32, #tpu.memory_space<vmem>>, vector<16x8xf32>
    %80 = arith.maximumf %78, %79 : vector<16x8xf32>
    %c192_48 = arith.constant 192 : index
    %c0_49 = arith.constant 0 : index
    %81 = vector.load %arg1[%c192_48, %c0_49] : memref<256x8xf32, #tpu.memory_space<vmem>>, vector<16x8xf32>
    %82 = arith.maximumf %80, %81 : vector<16x8xf32>
    %c208_50 = arith.constant 208 : index
    %c0_51 = arith.constant 0 : index
    %83 = vector.load %arg1[%c208_50, %c0_51] : memref<256x8xf32, #tpu.memory_space<vmem>>, vector<16x8xf32>
    %84 = arith.maximumf %82, %83 : vector<16x8xf32>
    %c224_52 = arith.constant 224 : index
    %c0_53 = arith.constant 0 : index
    %85 = vector.load %arg1[%c224_52, %c0_53] : memref<256x8xf32, #tpu.memory_space<vmem>>, vector<16x8xf32>
    %86 = arith.maximumf %84, %85 : vector<16x8xf32>
    %c240_54 = arith.constant 240 : index
    %c0_55 = arith.constant 0 : index
    %87 = vector.load %arg1[%c240_54, %c0_55] : memref<256x8xf32, #tpu.memory_space<vmem>>, vector<16x8xf32>
    %88 = arith.maximumf %86, %87 : vector<16x8xf32>
    %c0_i32_56 = arith.constant 0 : i32
    %89 = vector.broadcast %c0_i32_56 : i32 to vector<16x8xi32>
    %90 = arith.cmpi sge, %0, %89 : vector<16x8xi32>
    %c8_i32_57 = arith.constant 8 : i32
    %91 = vector.broadcast %c8_i32_57 : i32 to vector<16x8xi32>
    %92 = arith.cmpi slt, %0, %91 : vector<16x8xi32>
    %93 = arith.andi %90, %92 : vector<16x8xi1>
    %cst_58 = arith.constant -3.40282347E+38 : f32
    %94 = vector.broadcast %cst_58 : f32 to vector<16x8xf32>
    %95 = arith.select %93, %88, %94 : vector<16x8xi1>, vector<16x8xf32>
    %cst_59 = arith.constant dense<0xFF800000> : vector<8xf32>
    %96 = vector.multi_reduction <maximumf>, %95, %cst_59 [0] : vector<16x8xf32> to vector<8xf32>
    %97 = vector.shape_cast %96 : vector<8xf32> to vector<1x8xf32>
    %c8_i32_60 = arith.constant 8 : i32
    %98 = vector.broadcast %c8_i32_60 : i32 to vector<16x8xi32>
    %99 = arith.cmpi sge, %0, %98 : vector<16x8xi32>
    %c16_i32_61 = arith.constant 16 : i32
    %100 = vector.broadcast %c16_i32_61 : i32 to vector<16x8xi32>
    %101 = arith.cmpi slt, %0, %100 : vector<16x8xi32>
    %102 = arith.andi %99, %101 : vector<16x8xi1>
    %cst_62 = arith.constant -3.40282347E+38 : f32
    %103 = vector.broadcast %cst_62 : f32 to vector<16x8xf32>
    %104 = arith.select %102, %88, %103 : vector<16x8xi1>, vector<16x8xf32>
    %cst_63 = arith.constant dense<0xFF800000> : vector<8xf32>
    %105 = vector.multi_reduction <maximumf>, %104, %cst_63 [0] : vector<16x8xf32> to vector<8xf32>
    %106 = vector.shape_cast %105 : vector<8xf32> to vector<1x8xf32>
    %c0_64 = arith.constant 0 : index
    %c0_65 = arith.constant 0 : index
    %107 = vector.load %arg1[%c0_64, %c0_65] : memref<256x8xf32, #tpu.memory_space<vmem>>, vector<16x8xf32>
    %c16_66 = arith.constant 16 : index
    %c0_67 = arith.constant 0 : index
    %108 = vector.load %arg1[%c16_66, %c0_67] : memref<256x8xf32, #tpu.memory_space<vmem>>, vector<16x8xf32>
    %109 = arith.maximumf %107, %108 : vector<16x8xf32>
    %c32_68 = arith.constant 32 : index
    %c0_69 = arith.constant 0 : index
    %110 = vector.load %arg1[%c32_68, %c0_69] : memref<256x8xf32, #tpu.memory_space<vmem>>, vector<16x8xf32>
    %111 = arith.maximumf %109, %110 : vector<16x8xf32>
    %c48_70 = arith.constant 48 : index
    %c0_71 = arith.constant 0 : index
    %112 = vector.load %arg1[%c48_70, %c0_71] : memref<256x8xf32, #tpu.memory_space<vmem>>, vector<16x8xf32>
    %113 = arith.maximumf %111, %112 : vector<16x8xf32>
    %c64_72 = arith.constant 64 : index
    %c0_73 = arith.constant 0 : index
    %114 = vector.load %arg1[%c64_72, %c0_73] : memref<256x8xf32, #tpu.memory_space<vmem>>, vector<16x8xf32>
    %115 = arith.maximumf %113, %114 : vector<16x8xf32>
    %c0_i32_74 = arith.constant 0 : i32
    %116 = vector.broadcast %c0_i32_74 : i32 to vector<16x8xi32>
    %117 = arith.cmpi sge, %0, %116 : vector<16x8xi32>
    %c5_i32 = arith.constant 5 : i32
    %118 = vector.broadcast %c5_i32 : i32 to vector<16x8xi32>
    %119 = arith.cmpi slt, %0, %118 : vector<16x8xi32>
    %120 = arith.andi %117, %119 : vector<16x8xi1>
    %cst_75 = arith.constant -3.40282347E+38 : f32
    %121 = vector.broadcast %cst_75 : f32 to vector<16x8xf32>
    %122 = arith.select %120, %115, %121 : vector<16x8xi1>, vector<16x8xf32>
    %cst_76 = arith.constant dense<0xFF800000> : vector<8xf32>
    %123 = vector.multi_reduction <maximumf>, %122, %cst_76 [0] : vector<16x8xf32> to vector<8xf32>
    %124 = vector.shape_cast %123 : vector<8xf32> to vector<1x8xf32>
    %cst_77 = arith.constant 0.000000e+00 : f32
    %125 = vector.broadcast %cst_77 : f32 to vector<1x8xf32>
    %126 = arith.maximumf %124, %125 : vector<1x8xf32>
    %c5_i32_78 = arith.constant 5 : i32
    %127 = vector.broadcast %c5_i32_78 : i32 to vector<16x8xi32>
    %128 = arith.cmpi sge, %0, %127 : vector<16x8xi32>
    %c11_i32 = arith.constant 11 : i32
    %129 = vector.broadcast %c11_i32 : i32 to vector<16x8xi32>
    %130 = arith.cmpi slt, %0, %129 : vector<16x8xi32>
    %131 = arith.andi %128, %130 : vector<16x8xi1>
    %cst_79 = arith.constant -3.40282347E+38 : f32
    %132 = vector.broadcast %cst_79 : f32 to vector<16x8xf32>
    %133 = arith.select %131, %115, %132 : vector<16x8xi1>, vector<16x8xf32>
    %cst_80 = arith.constant dense<0xFF800000> : vector<8xf32>
    %134 = vector.multi_reduction <maximumf>, %133, %cst_80 [0] : vector<16x8xf32> to vector<8xf32>
    %135 = vector.shape_cast %134 : vector<8xf32> to vector<1x8xf32>
    %cst_81 = arith.constant 0.000000e+00 : f32
    %136 = vector.broadcast %cst_81 : f32 to vector<1x8xf32>
    %137 = arith.maximumf %135, %136 : vector<1x8xf32>
    %c11_i32_82 = arith.constant 11 : i32
    %138 = vector.broadcast %c11_i32_82 : i32 to vector<16x8xi32>
    %139 = arith.cmpi sge, %0, %138 : vector<16x8xi32>
    %c16_i32_83 = arith.constant 16 : i32
    %140 = vector.broadcast %c16_i32_83 : i32 to vector<16x8xi32>
    %141 = arith.cmpi slt, %0, %140 : vector<16x8xi32>
    %142 = arith.andi %139, %141 : vector<16x8xi1>
    %cst_84 = arith.constant -3.40282347E+38 : f32
    %143 = vector.broadcast %cst_84 : f32 to vector<16x8xf32>
    %144 = arith.select %142, %115, %143 : vector<16x8xi1>, vector<16x8xf32>
    %cst_85 = arith.constant dense<0xFF800000> : vector<8xf32>
    %145 = vector.multi_reduction <maximumf>, %144, %cst_85 [0] : vector<16x8xf32> to vector<8xf32>
    %146 = vector.shape_cast %145 : vector<8xf32> to vector<1x8xf32>
    %cst_86 = arith.constant 0.000000e+00 : f32
    %147 = vector.broadcast %cst_86 : f32 to vector<1x8xf32>
    %148 = arith.maximumf %146, %147 : vector<1x8xf32>
    %c80_87 = arith.constant 80 : index
    %c0_88 = arith.constant 0 : index
    %149 = vector.load %arg1[%c80_87, %c0_88] : memref<256x8xf32, #tpu.memory_space<vmem>>, vector<16x8xf32>
    %c96_89 = arith.constant 96 : index
    %c0_90 = arith.constant 0 : index
    %150 = vector.load %arg1[%c96_89, %c0_90] : memref<256x8xf32, #tpu.memory_space<vmem>>, vector<16x8xf32>
    %151 = arith.maximumf %149, %150 : vector<16x8xf32>
    %c112_91 = arith.constant 112 : index
    %c0_92 = arith.constant 0 : index
    %152 = vector.load %arg1[%c112_91, %c0_92] : memref<256x8xf32, #tpu.memory_space<vmem>>, vector<16x8xf32>
    %153 = arith.maximumf %151, %152 : vector<16x8xf32>
    %c128_93 = arith.constant 128 : index
    %c0_94 = arith.constant 0 : index
    %154 = vector.load %arg1[%c128_93, %c0_94] : memref<256x8xf32, #tpu.memory_space<vmem>>, vector<16x8xf32>
    %155 = arith.maximumf %153, %154 : vector<16x8xf32>
    %c144_95 = arith.constant 144 : index
    %c0_96 = arith.constant 0 : index
    %156 = vector.load %arg1[%c144_95, %c0_96] : memref<256x8xf32, #tpu.memory_space<vmem>>, vector<16x8xf32>
    %157 = arith.maximumf %155, %156 : vector<16x8xf32>
    %c160_97 = arith.constant 160 : index
    %c0_98 = arith.constant 0 : index
    %158 = vector.load %arg1[%c160_97, %c0_98] : memref<256x8xf32, #tpu.memory_space<vmem>>, vector<16x8xf32>
    %159 = arith.maximumf %157, %158 : vector<16x8xf32>
    %c0_i32_99 = arith.constant 0 : i32
    %160 = vector.broadcast %c0_i32_99 : i32 to vector<16x8xi32>
    %161 = arith.cmpi sge, %0, %160 : vector<16x8xi32>
    %c5_i32_100 = arith.constant 5 : i32
    %162 = vector.broadcast %c5_i32_100 : i32 to vector<16x8xi32>
    %163 = arith.cmpi slt, %0, %162 : vector<16x8xi32>
    %164 = arith.andi %161, %163 : vector<16x8xi1>
    %cst_101 = arith.constant -3.40282347E+38 : f32
    %165 = vector.broadcast %cst_101 : f32 to vector<16x8xf32>
    %166 = arith.select %164, %159, %165 : vector<16x8xi1>, vector<16x8xf32>
    %cst_102 = arith.constant dense<0xFF800000> : vector<8xf32>
    %167 = vector.multi_reduction <maximumf>, %166, %cst_102 [0] : vector<16x8xf32> to vector<8xf32>
    %168 = vector.shape_cast %167 : vector<8xf32> to vector<1x8xf32>
    %cst_103 = arith.constant 0.000000e+00 : f32
    %169 = vector.broadcast %cst_103 : f32 to vector<1x8xf32>
    %170 = arith.maximumf %168, %169 : vector<1x8xf32>
    %c5_i32_104 = arith.constant 5 : i32
    %171 = vector.broadcast %c5_i32_104 : i32 to vector<16x8xi32>
    %172 = arith.cmpi sge, %0, %171 : vector<16x8xi32>
    %c11_i32_105 = arith.constant 11 : i32
    %173 = vector.broadcast %c11_i32_105 : i32 to vector<16x8xi32>
    %174 = arith.cmpi slt, %0, %173 : vector<16x8xi32>
    %175 = arith.andi %172, %174 : vector<16x8xi1>
    %cst_106 = arith.constant -3.40282347E+38 : f32
    %176 = vector.broadcast %cst_106 : f32 to vector<16x8xf32>
    %177 = arith.select %175, %159, %176 : vector<16x8xi1>, vector<16x8xf32>
    %cst_107 = arith.constant dense<0xFF800000> : vector<8xf32>
    %178 = vector.multi_reduction <maximumf>, %177, %cst_107 [0] : vector<16x8xf32> to vector<8xf32>
    %179 = vector.shape_cast %178 : vector<8xf32> to vector<1x8xf32>
    %c11_i32_108 = arith.constant 11 : i32
    %180 = vector.broadcast %c11_i32_108 : i32 to vector<16x8xi32>
    %181 = arith.cmpi sge, %0, %180 : vector<16x8xi32>
    %c16_i32_109 = arith.constant 16 : i32
    %182 = vector.broadcast %c16_i32_109 : i32 to vector<16x8xi32>
    %183 = arith.cmpi slt, %0, %182 : vector<16x8xi32>
    %184 = arith.andi %181, %183 : vector<16x8xi1>
    %cst_110 = arith.constant -3.40282347E+38 : f32
    %185 = vector.broadcast %cst_110 : f32 to vector<16x8xf32>
    %186 = arith.select %184, %159, %185 : vector<16x8xi1>, vector<16x8xf32>
    %cst_111 = arith.constant dense<0xFF800000> : vector<8xf32>
    %187 = vector.multi_reduction <maximumf>, %186, %cst_111 [0] : vector<16x8xf32> to vector<8xf32>
    %188 = vector.shape_cast %187 : vector<8xf32> to vector<1x8xf32>
    %cst_112 = arith.constant 0.000000e+00 : f32
    %189 = vector.broadcast %cst_112 : f32 to vector<1x8xf32>
    %190 = arith.maximumf %188, %189 : vector<1x8xf32>
    %c176_113 = arith.constant 176 : index
    %c0_114 = arith.constant 0 : index
    %191 = vector.load %arg1[%c176_113, %c0_114] : memref<256x8xf32, #tpu.memory_space<vmem>>, vector<16x8xf32>
    %c192_115 = arith.constant 192 : index
    %c0_116 = arith.constant 0 : index
    %192 = vector.load %arg1[%c192_115, %c0_116] : memref<256x8xf32, #tpu.memory_space<vmem>>, vector<16x8xf32>
    %193 = arith.maximumf %191, %192 : vector<16x8xf32>
    %c208_117 = arith.constant 208 : index
    %c0_118 = arith.constant 0 : index
    %194 = vector.load %arg1[%c208_117, %c0_118] : memref<256x8xf32, #tpu.memory_space<vmem>>, vector<16x8xf32>
    %195 = arith.maximumf %193, %194 : vector<16x8xf32>
    %c224_119 = arith.constant 224 : index
    %c0_120 = arith.constant 0 : index
    %196 = vector.load %arg1[%c224_119, %c0_120] : memref<256x8xf32, #tpu.memory_space<vmem>>, vector<16x8xf32>
    %197 = arith.maximumf %195, %196 : vector<16x8xf32>
    %c240_121 = arith.constant 240 : index
    %c0_122 = arith.constant 0 : index
    %198 = vector.load %arg1[%c240_121, %c0_122] : memref<256x8xf32, #tpu.memory_space<vmem>>, vector<16x8xf32>
    %199 = arith.maximumf %197, %198 : vector<16x8xf32>
    %c0_i32_123 = arith.constant 0 : i32
    %200 = vector.broadcast %c0_i32_123 : i32 to vector<16x8xi32>
    %201 = arith.cmpi sge, %0, %200 : vector<16x8xi32>
    %c5_i32_124 = arith.constant 5 : i32
    %202 = vector.broadcast %c5_i32_124 : i32 to vector<16x8xi32>
    %203 = arith.cmpi slt, %0, %202 : vector<16x8xi32>
    %204 = arith.andi %201, %203 : vector<16x8xi1>
    %cst_125 = arith.constant -3.40282347E+38 : f32
    %205 = vector.broadcast %cst_125 : f32 to vector<16x8xf32>
    %206 = arith.select %204, %199, %205 : vector<16x8xi1>, vector<16x8xf32>
    %cst_126 = arith.constant dense<0xFF800000> : vector<8xf32>
    %207 = vector.multi_reduction <maximumf>, %206, %cst_126 [0] : vector<16x8xf32> to vector<8xf32>
    %208 = vector.shape_cast %207 : vector<8xf32> to vector<1x8xf32>
    %cst_127 = arith.constant 0.000000e+00 : f32
    %209 = vector.broadcast %cst_127 : f32 to vector<1x8xf32>
    %210 = arith.maximumf %208, %209 : vector<1x8xf32>
    %c5_i32_128 = arith.constant 5 : i32
    %211 = vector.broadcast %c5_i32_128 : i32 to vector<16x8xi32>
    %212 = arith.cmpi sge, %0, %211 : vector<16x8xi32>
    %c11_i32_129 = arith.constant 11 : i32
    %213 = vector.broadcast %c11_i32_129 : i32 to vector<16x8xi32>
    %214 = arith.cmpi slt, %0, %213 : vector<16x8xi32>
    %215 = arith.andi %212, %214 : vector<16x8xi1>
    %cst_130 = arith.constant -3.40282347E+38 : f32
    %216 = vector.broadcast %cst_130 : f32 to vector<16x8xf32>
    %217 = arith.select %215, %199, %216 : vector<16x8xi1>, vector<16x8xf32>
    %cst_131 = arith.constant dense<0xFF800000> : vector<8xf32>
    %218 = vector.multi_reduction <maximumf>, %217, %cst_131 [0] : vector<16x8xf32> to vector<8xf32>
    %219 = vector.shape_cast %218 : vector<8xf32> to vector<1x8xf32>
    %cst_132 = arith.constant 0.000000e+00 : f32
    %220 = vector.broadcast %cst_132 : f32 to vector<1x8xf32>
    %221 = arith.maximumf %219, %220 : vector<1x8xf32>
    %c11_i32_133 = arith.constant 11 : i32
    %222 = vector.broadcast %c11_i32_133 : i32 to vector<16x8xi32>
    %223 = arith.cmpi sge, %0, %222 : vector<16x8xi32>
    %c16_i32_134 = arith.constant 16 : i32
    %224 = vector.broadcast %c16_i32_134 : i32 to vector<16x8xi32>
    %225 = arith.cmpi slt, %0, %224 : vector<16x8xi32>
    %226 = arith.andi %223, %225 : vector<16x8xi1>
    %cst_135 = arith.constant -3.40282347E+38 : f32
    %227 = vector.broadcast %cst_135 : f32 to vector<16x8xf32>
    %228 = arith.select %226, %199, %227 : vector<16x8xi1>, vector<16x8xf32>
    %cst_136 = arith.constant dense<0xFF800000> : vector<8xf32>
    %229 = vector.multi_reduction <maximumf>, %228, %cst_136 [0] : vector<16x8xf32> to vector<8xf32>
    %230 = vector.shape_cast %229 : vector<8xf32> to vector<1x8xf32>
    %cst_137 = arith.constant 0.000000e+00 : f32
    %231 = vector.broadcast %cst_137 : f32 to vector<1x8xf32>
    %232 = arith.maximumf %230, %231 : vector<1x8xf32>
    %c0_138 = arith.constant 0 : index
    %c0_139 = arith.constant 0 : index
    %233 = vector.load %arg1[%c0_138, %c0_139] : memref<256x8xf32, #tpu.memory_space<vmem>>, vector<16x8xf32>
    %c16_140 = arith.constant 16 : index
    %c0_141 = arith.constant 0 : index
    %234 = vector.load %arg1[%c16_140, %c0_141] : memref<256x8xf32, #tpu.memory_space<vmem>>, vector<16x8xf32>
    %235 = arith.maximumf %233, %234 : vector<16x8xf32>
    %c32_142 = arith.constant 32 : index
    %c0_143 = arith.constant 0 : index
    %236 = vector.load %arg1[%c32_142, %c0_143] : memref<256x8xf32, #tpu.memory_space<vmem>>, vector<16x8xf32>
    %237 = arith.maximumf %235, %236 : vector<16x8xf32>
    %c48_144 = arith.constant 48 : index
    %c0_145 = arith.constant 0 : index
    %238 = vector.load %arg1[%c48_144, %c0_145] : memref<256x8xf32, #tpu.memory_space<vmem>>, vector<16x8xf32>
    %239 = arith.maximumf %237, %238 : vector<16x8xf32>
    %c0_i32_146 = arith.constant 0 : i32
    %240 = vector.broadcast %c0_i32_146 : i32 to vector<16x8xi32>
    %241 = arith.cmpi sge, %0, %240 : vector<16x8xi32>
    %c4_i32 = arith.constant 4 : i32
    %242 = vector.broadcast %c4_i32 : i32 to vector<16x8xi32>
    %243 = arith.cmpi slt, %0, %242 : vector<16x8xi32>
    %244 = arith.andi %241, %243 : vector<16x8xi1>
    %cst_147 = arith.constant -3.40282347E+38 : f32
    %245 = vector.broadcast %cst_147 : f32 to vector<16x8xf32>
    %246 = arith.select %244, %239, %245 : vector<16x8xi1>, vector<16x8xf32>
    %cst_148 = arith.constant dense<0xFF800000> : vector<8xf32>
    %247 = vector.multi_reduction <maximumf>, %246, %cst_148 [0] : vector<16x8xf32> to vector<8xf32>
    %248 = vector.shape_cast %247 : vector<8xf32> to vector<1x8xf32>
    %c4_i32_149 = arith.constant 4 : i32
    %249 = vector.broadcast %c4_i32_149 : i32 to vector<16x8xi32>
    %250 = arith.cmpi sge, %0, %249 : vector<16x8xi32>
    %c8_i32_150 = arith.constant 8 : i32
    %251 = vector.broadcast %c8_i32_150 : i32 to vector<16x8xi32>
    %252 = arith.cmpi slt, %0, %251 : vector<16x8xi32>
    %253 = arith.andi %250, %252 : vector<16x8xi1>
    %cst_151 = arith.constant -3.40282347E+38 : f32
    %254 = vector.broadcast %cst_151 : f32 to vector<16x8xf32>
    %255 = arith.select %253, %239, %254 : vector<16x8xi1>, vector<16x8xf32>
    %cst_152 = arith.constant dense<0xFF800000> : vector<8xf32>
    %256 = vector.multi_reduction <maximumf>, %255, %cst_152 [0] : vector<16x8xf32> to vector<8xf32>
    %257 = vector.shape_cast %256 : vector<8xf32> to vector<1x8xf32>
    %c8_i32_153 = arith.constant 8 : i32
    %258 = vector.broadcast %c8_i32_153 : i32 to vector<16x8xi32>
    %259 = arith.cmpi sge, %0, %258 : vector<16x8xi32>
    %c12_i32 = arith.constant 12 : i32
    %260 = vector.broadcast %c12_i32 : i32 to vector<16x8xi32>
    %261 = arith.cmpi slt, %0, %260 : vector<16x8xi32>
    %262 = arith.andi %259, %261 : vector<16x8xi1>
    %cst_154 = arith.constant -3.40282347E+38 : f32
    %263 = vector.broadcast %cst_154 : f32 to vector<16x8xf32>
    %264 = arith.select %262, %239, %263 : vector<16x8xi1>, vector<16x8xf32>
    %cst_155 = arith.constant dense<0xFF800000> : vector<8xf32>
    %265 = vector.multi_reduction <maximumf>, %264, %cst_155 [0] : vector<16x8xf32> to vector<8xf32>
    %266 = vector.shape_cast %265 : vector<8xf32> to vector<1x8xf32>
    %c12_i32_156 = arith.constant 12 : i32
    %267 = vector.broadcast %c12_i32_156 : i32 to vector<16x8xi32>
    %268 = arith.cmpi sge, %0, %267 : vector<16x8xi32>
    %c16_i32_157 = arith.constant 16 : i32
    %269 = vector.broadcast %c16_i32_157 : i32 to vector<16x8xi32>
    %270 = arith.cmpi slt, %0, %269 : vector<16x8xi32>
    %271 = arith.andi %268, %270 : vector<16x8xi1>
    %cst_158 = arith.constant -3.40282347E+38 : f32
    %272 = vector.broadcast %cst_158 : f32 to vector<16x8xf32>
    %273 = arith.select %271, %239, %272 : vector<16x8xi1>, vector<16x8xf32>
    %cst_159 = arith.constant dense<0xFF800000> : vector<8xf32>
    %274 = vector.multi_reduction <maximumf>, %273, %cst_159 [0] : vector<16x8xf32> to vector<8xf32>
    %275 = vector.shape_cast %274 : vector<8xf32> to vector<1x8xf32>
    %c64_160 = arith.constant 64 : index
    %c0_161 = arith.constant 0 : index
    %276 = vector.load %arg1[%c64_160, %c0_161] : memref<256x8xf32, #tpu.memory_space<vmem>>, vector<16x8xf32>
    %c80_162 = arith.constant 80 : index
    %c0_163 = arith.constant 0 : index
    %277 = vector.load %arg1[%c80_162, %c0_163] : memref<256x8xf32, #tpu.memory_space<vmem>>, vector<16x8xf32>
    %278 = arith.maximumf %276, %277 : vector<16x8xf32>
    %c96_164 = arith.constant 96 : index
    %c0_165 = arith.constant 0 : index
    %279 = vector.load %arg1[%c96_164, %c0_165] : memref<256x8xf32, #tpu.memory_space<vmem>>, vector<16x8xf32>
    %280 = arith.maximumf %278, %279 : vector<16x8xf32>
    %c112_166 = arith.constant 112 : index
    %c0_167 = arith.constant 0 : index
    %281 = vector.load %arg1[%c112_166, %c0_167] : memref<256x8xf32, #tpu.memory_space<vmem>>, vector<16x8xf32>
    %282 = arith.maximumf %280, %281 : vector<16x8xf32>
    %c0_i32_168 = arith.constant 0 : i32
    %283 = vector.broadcast %c0_i32_168 : i32 to vector<16x8xi32>
    %284 = arith.cmpi sge, %0, %283 : vector<16x8xi32>
    %c4_i32_169 = arith.constant 4 : i32
    %285 = vector.broadcast %c4_i32_169 : i32 to vector<16x8xi32>
    %286 = arith.cmpi slt, %0, %285 : vector<16x8xi32>
    %287 = arith.andi %284, %286 : vector<16x8xi1>
    %cst_170 = arith.constant -3.40282347E+38 : f32
    %288 = vector.broadcast %cst_170 : f32 to vector<16x8xf32>
    %289 = arith.select %287, %282, %288 : vector<16x8xi1>, vector<16x8xf32>
    %cst_171 = arith.constant dense<0xFF800000> : vector<8xf32>
    %290 = vector.multi_reduction <maximumf>, %289, %cst_171 [0] : vector<16x8xf32> to vector<8xf32>
    %291 = vector.shape_cast %290 : vector<8xf32> to vector<1x8xf32>
    %c4_i32_172 = arith.constant 4 : i32
    %292 = vector.broadcast %c4_i32_172 : i32 to vector<16x8xi32>
    %293 = arith.cmpi sge, %0, %292 : vector<16x8xi32>
    %c8_i32_173 = arith.constant 8 : i32
    %294 = vector.broadcast %c8_i32_173 : i32 to vector<16x8xi32>
    %295 = arith.cmpi slt, %0, %294 : vector<16x8xi32>
    %296 = arith.andi %293, %295 : vector<16x8xi1>
    %cst_174 = arith.constant -3.40282347E+38 : f32
    %297 = vector.broadcast %cst_174 : f32 to vector<16x8xf32>
    %298 = arith.select %296, %282, %297 : vector<16x8xi1>, vector<16x8xf32>
    %cst_175 = arith.constant dense<0xFF800000> : vector<8xf32>
    %299 = vector.multi_reduction <maximumf>, %298, %cst_175 [0] : vector<16x8xf32> to vector<8xf32>
    %300 = vector.shape_cast %299 : vector<8xf32> to vector<1x8xf32>
    %c8_i32_176 = arith.constant 8 : i32
    %301 = vector.broadcast %c8_i32_176 : i32 to vector<16x8xi32>
    %302 = arith.cmpi sge, %0, %301 : vector<16x8xi32>
    %c12_i32_177 = arith.constant 12 : i32
    %303 = vector.broadcast %c12_i32_177 : i32 to vector<16x8xi32>
    %304 = arith.cmpi slt, %0, %303 : vector<16x8xi32>
    %305 = arith.andi %302, %304 : vector<16x8xi1>
    %cst_178 = arith.constant -3.40282347E+38 : f32
    %306 = vector.broadcast %cst_178 : f32 to vector<16x8xf32>
    %307 = arith.select %305, %282, %306 : vector<16x8xi1>, vector<16x8xf32>
    %cst_179 = arith.constant dense<0xFF800000> : vector<8xf32>
    %308 = vector.multi_reduction <maximumf>, %307, %cst_179 [0] : vector<16x8xf32> to vector<8xf32>
    %309 = vector.shape_cast %308 : vector<8xf32> to vector<1x8xf32>
    %c12_i32_180 = arith.constant 12 : i32
    %310 = vector.broadcast %c12_i32_180 : i32 to vector<16x8xi32>
    %311 = arith.cmpi sge, %0, %310 : vector<16x8xi32>
    %c16_i32_181 = arith.constant 16 : i32
    %312 = vector.broadcast %c16_i32_181 : i32 to vector<16x8xi32>
    %313 = arith.cmpi slt, %0, %312 : vector<16x8xi32>
    %314 = arith.andi %311, %313 : vector<16x8xi1>
    %cst_182 = arith.constant -3.40282347E+38 : f32
    %315 = vector.broadcast %cst_182 : f32 to vector<16x8xf32>
    %316 = arith.select %314, %282, %315 : vector<16x8xi1>, vector<16x8xf32>
    %cst_183 = arith.constant dense<0xFF800000> : vector<8xf32>
    %317 = vector.multi_reduction <maximumf>, %316, %cst_183 [0] : vector<16x8xf32> to vector<8xf32>
    %318 = vector.shape_cast %317 : vector<8xf32> to vector<1x8xf32>
    %c128_184 = arith.constant 128 : index
    %c0_185 = arith.constant 0 : index
    %319 = vector.load %arg1[%c128_184, %c0_185] : memref<256x8xf32, #tpu.memory_space<vmem>>, vector<16x8xf32>
    %c144_186 = arith.constant 144 : index
    %c0_187 = arith.constant 0 : index
    %320 = vector.load %arg1[%c144_186, %c0_187] : memref<256x8xf32, #tpu.memory_space<vmem>>, vector<16x8xf32>
    %321 = arith.maximumf %319, %320 : vector<16x8xf32>
    %c160_188 = arith.constant 160 : index
    %c0_189 = arith.constant 0 : index
    %322 = vector.load %arg1[%c160_188, %c0_189] : memref<256x8xf32, #tpu.memory_space<vmem>>, vector<16x8xf32>
    %323 = arith.maximumf %321, %322 : vector<16x8xf32>
    %c176_190 = arith.constant 176 : index
    %c0_191 = arith.constant 0 : index
    %324 = vector.load %arg1[%c176_190, %c0_191] : memref<256x8xf32, #tpu.memory_space<vmem>>, vector<16x8xf32>
    %325 = arith.maximumf %323, %324 : vector<16x8xf32>
    %c0_i32_192 = arith.constant 0 : i32
    %326 = vector.broadcast %c0_i32_192 : i32 to vector<16x8xi32>
    %327 = arith.cmpi sge, %0, %326 : vector<16x8xi32>
    %c4_i32_193 = arith.constant 4 : i32
    %328 = vector.broadcast %c4_i32_193 : i32 to vector<16x8xi32>
    %329 = arith.cmpi slt, %0, %328 : vector<16x8xi32>
    %330 = arith.andi %327, %329 : vector<16x8xi1>
    %cst_194 = arith.constant -3.40282347E+38 : f32
    %331 = vector.broadcast %cst_194 : f32 to vector<16x8xf32>
    %332 = arith.select %330, %325, %331 : vector<16x8xi1>, vector<16x8xf32>
    %cst_195 = arith.constant dense<0xFF800000> : vector<8xf32>
    %333 = vector.multi_reduction <maximumf>, %332, %cst_195 [0] : vector<16x8xf32> to vector<8xf32>
    %334 = vector.shape_cast %333 : vector<8xf32> to vector<1x8xf32>
    %c4_i32_196 = arith.constant 4 : i32
    %335 = vector.broadcast %c4_i32_196 : i32 to vector<16x8xi32>
    %336 = arith.cmpi sge, %0, %335 : vector<16x8xi32>
    %c8_i32_197 = arith.constant 8 : i32
    %337 = vector.broadcast %c8_i32_197 : i32 to vector<16x8xi32>
    %338 = arith.cmpi slt, %0, %337 : vector<16x8xi32>
    %339 = arith.andi %336, %338 : vector<16x8xi1>
    %cst_198 = arith.constant -3.40282347E+38 : f32
    %340 = vector.broadcast %cst_198 : f32 to vector<16x8xf32>
    %341 = arith.select %339, %325, %340 : vector<16x8xi1>, vector<16x8xf32>
    %cst_199 = arith.constant dense<0xFF800000> : vector<8xf32>
    %342 = vector.multi_reduction <maximumf>, %341, %cst_199 [0] : vector<16x8xf32> to vector<8xf32>
    %343 = vector.shape_cast %342 : vector<8xf32> to vector<1x8xf32>
    %c8_i32_200 = arith.constant 8 : i32
    %344 = vector.broadcast %c8_i32_200 : i32 to vector<16x8xi32>
    %345 = arith.cmpi sge, %0, %344 : vector<16x8xi32>
    %c12_i32_201 = arith.constant 12 : i32
    %346 = vector.broadcast %c12_i32_201 : i32 to vector<16x8xi32>
    %347 = arith.cmpi slt, %0, %346 : vector<16x8xi32>
    %348 = arith.andi %345, %347 : vector<16x8xi1>
    %cst_202 = arith.constant -3.40282347E+38 : f32
    %349 = vector.broadcast %cst_202 : f32 to vector<16x8xf32>
    %350 = arith.select %348, %325, %349 : vector<16x8xi1>, vector<16x8xf32>
    %cst_203 = arith.constant dense<0xFF800000> : vector<8xf32>
    %351 = vector.multi_reduction <maximumf>, %350, %cst_203 [0] : vector<16x8xf32> to vector<8xf32>
    %352 = vector.shape_cast %351 : vector<8xf32> to vector<1x8xf32>
    %c12_i32_204 = arith.constant 12 : i32
    %353 = vector.broadcast %c12_i32_204 : i32 to vector<16x8xi32>
    %354 = arith.cmpi sge, %0, %353 : vector<16x8xi32>
    %c16_i32_205 = arith.constant 16 : i32
    %355 = vector.broadcast %c16_i32_205 : i32 to vector<16x8xi32>
    %356 = arith.cmpi slt, %0, %355 : vector<16x8xi32>
    %357 = arith.andi %354, %356 : vector<16x8xi1>
    %cst_206 = arith.constant -3.40282347E+38 : f32
    %358 = vector.broadcast %cst_206 : f32 to vector<16x8xf32>
    %359 = arith.select %357, %325, %358 : vector<16x8xi1>, vector<16x8xf32>
    %cst_207 = arith.constant dense<0xFF800000> : vector<8xf32>
    %360 = vector.multi_reduction <maximumf>, %359, %cst_207 [0] : vector<16x8xf32> to vector<8xf32>
    %361 = vector.shape_cast %360 : vector<8xf32> to vector<1x8xf32>
    %c192_208 = arith.constant 192 : index
    %c0_209 = arith.constant 0 : index
    %362 = vector.load %arg1[%c192_208, %c0_209] : memref<256x8xf32, #tpu.memory_space<vmem>>, vector<16x8xf32>
    %c208_210 = arith.constant 208 : index
    %c0_211 = arith.constant 0 : index
    %363 = vector.load %arg1[%c208_210, %c0_211] : memref<256x8xf32, #tpu.memory_space<vmem>>, vector<16x8xf32>
    %364 = arith.maximumf %362, %363 : vector<16x8xf32>
    %c224_212 = arith.constant 224 : index
    %c0_213 = arith.constant 0 : index
    %365 = vector.load %arg1[%c224_212, %c0_213] : memref<256x8xf32, #tpu.memory_space<vmem>>, vector<16x8xf32>
    %366 = arith.maximumf %364, %365 : vector<16x8xf32>
    %c240_214 = arith.constant 240 : index
    %c0_215 = arith.constant 0 : index
    %367 = vector.load %arg1[%c240_214, %c0_215] : memref<256x8xf32, #tpu.memory_space<vmem>>, vector<16x8xf32>
    %368 = arith.maximumf %366, %367 : vector<16x8xf32>
    %c0_i32_216 = arith.constant 0 : i32
    %369 = vector.broadcast %c0_i32_216 : i32 to vector<16x8xi32>
    %370 = arith.cmpi sge, %0, %369 : vector<16x8xi32>
    %c4_i32_217 = arith.constant 4 : i32
    %371 = vector.broadcast %c4_i32_217 : i32 to vector<16x8xi32>
    %372 = arith.cmpi slt, %0, %371 : vector<16x8xi32>
    %373 = arith.andi %370, %372 : vector<16x8xi1>
    %cst_218 = arith.constant -3.40282347E+38 : f32
    %374 = vector.broadcast %cst_218 : f32 to vector<16x8xf32>
    %375 = arith.select %373, %368, %374 : vector<16x8xi1>, vector<16x8xf32>
    %cst_219 = arith.constant dense<0xFF800000> : vector<8xf32>
    %376 = vector.multi_reduction <maximumf>, %375, %cst_219 [0] : vector<16x8xf32> to vector<8xf32>
    %377 = vector.shape_cast %376 : vector<8xf32> to vector<1x8xf32>
    %c4_i32_220 = arith.constant 4 : i32
    %378 = vector.broadcast %c4_i32_220 : i32 to vector<16x8xi32>
    %379 = arith.cmpi sge, %0, %378 : vector<16x8xi32>
    %c8_i32_221 = arith.constant 8 : i32
    %380 = vector.broadcast %c8_i32_221 : i32 to vector<16x8xi32>
    %381 = arith.cmpi slt, %0, %380 : vector<16x8xi32>
    %382 = arith.andi %379, %381 : vector<16x8xi1>
    %cst_222 = arith.constant -3.40282347E+38 : f32
    %383 = vector.broadcast %cst_222 : f32 to vector<16x8xf32>
    %384 = arith.select %382, %368, %383 : vector<16x8xi1>, vector<16x8xf32>
    %cst_223 = arith.constant dense<0xFF800000> : vector<8xf32>
    %385 = vector.multi_reduction <maximumf>, %384, %cst_223 [0] : vector<16x8xf32> to vector<8xf32>
    %386 = vector.shape_cast %385 : vector<8xf32> to vector<1x8xf32>
    %c8_i32_224 = arith.constant 8 : i32
    %387 = vector.broadcast %c8_i32_224 : i32 to vector<16x8xi32>
    %388 = arith.cmpi sge, %0, %387 : vector<16x8xi32>
    %c12_i32_225 = arith.constant 12 : i32
    %389 = vector.broadcast %c12_i32_225 : i32 to vector<16x8xi32>
    %390 = arith.cmpi slt, %0, %389 : vector<16x8xi32>
    %391 = arith.andi %388, %390 : vector<16x8xi1>
    %cst_226 = arith.constant -3.40282347E+38 : f32
    %392 = vector.broadcast %cst_226 : f32 to vector<16x8xf32>
    %393 = arith.select %391, %368, %392 : vector<16x8xi1>, vector<16x8xf32>
    %cst_227 = arith.constant dense<0xFF800000> : vector<8xf32>
    %394 = vector.multi_reduction <maximumf>, %393, %cst_227 [0] : vector<16x8xf32> to vector<8xf32>
    %395 = vector.shape_cast %394 : vector<8xf32> to vector<1x8xf32>
    %c12_i32_228 = arith.constant 12 : i32
    %396 = vector.broadcast %c12_i32_228 : i32 to vector<16x8xi32>
    %397 = arith.cmpi sge, %0, %396 : vector<16x8xi32>
    %c16_i32_229 = arith.constant 16 : i32
    %398 = vector.broadcast %c16_i32_229 : i32 to vector<16x8xi32>
    %399 = arith.cmpi slt, %0, %398 : vector<16x8xi32>
    %400 = arith.andi %397, %399 : vector<16x8xi1>
    %cst_230 = arith.constant -3.40282347E+38 : f32
    %401 = vector.broadcast %cst_230 : f32 to vector<16x8xf32>
    %402 = arith.select %400, %368, %401 : vector<16x8xi1>, vector<16x8xf32>
    %cst_231 = arith.constant dense<0xFF800000> : vector<8xf32>
    %403 = vector.multi_reduction <maximumf>, %402, %cst_231 [0] : vector<16x8xf32> to vector<8xf32>
    %404 = vector.shape_cast %403 : vector<8xf32> to vector<1x8xf32>
    %405 = tpu.concatenate %40, %64, %73, %97, %106, %126, %137, %148, %170, %179, %190, %210, %221, %232, %248, %257 in 0 : vector<1x8xf32>, vector<1x8xf32>, vector<1x8xf32>, vector<1x8xf32>, vector<1x8xf32>, vector<1x8xf32>, vector<1x8xf32>, vector<1x8xf32>, vector<1x8xf32>, vector<1x8xf32>, vector<1x8xf32>, vector<1x8xf32>, vector<1x8xf32>, vector<1x8xf32>, vector<1x8xf32>, vector<1x8xf32> -> vector<16x8xf32>
    %406 = tpu.concatenate %266, %275, %291, %300, %309, %318, %334, %343, %352, %361, %377, %386, %395, %404 in 0 : vector<1x8xf32>, vector<1x8xf32>, vector<1x8xf32>, vector<1x8xf32>, vector<1x8xf32>, vector<1x8xf32>, vector<1x8xf32>, vector<1x8xf32>, vector<1x8xf32>, vector<1x8xf32>, vector<1x8xf32>, vector<1x8xf32>, vector<1x8xf32>, vector<1x8xf32> -> vector<14x8xf32>
    %407 = tpu.concatenate %405, %406 in 0 : vector<16x8xf32>, vector<14x8xf32> -> vector<30x8xf32>
    %c0_232 = arith.constant 0 : index
    %c0_233 = arith.constant 0 : index
    %408 = vector.load %arg2[%c0_232, %c0_233] : memref<30x8xf32, #tpu.memory_space<vmem>>, vector<30x8xf32>
    tpu.vector_store %arg2[%c0_232, %c0_233], %407 {strides = array<i32>} : memref<30x8xf32, #tpu.memory_space<vmem>>, vector<30x8xf32>,
    return
  }
  func.func @transform_0(%arg0: i32) -> (i32, i32) {
    %c0_i32 = arith.constant 0 : i32
    %c0_i32_0 = arith.constant 0 : i32
    return %c0_i32, %arg0 : i32, i32
  }
  func.func @transform_1(%arg0: i32) -> (i32, i32) {
    %c0_i32 = arith.constant 0 : i32
    %c0_i32_0 = arith.constant 0 : i32
    return %c0_i32, %arg0 : i32, i32
  }
}

</mosaic_0001>

<bundles_post_ra>
// kernel: tpu_custom_call.1
= control target key start
LH: loop header
LB: loop body
LE: loop exit
PB: predicated region body
PF: predicated region fallthrough
CT: control target
= control target key end

     0   :  { %v8_v0 = vlaneseq  ;;  %vm81_vm0 = vcmask 64512   ;;  %v543_v28 = vmov -inf   ;;  %vm500_vm9 = vcmask 1040384   ;;  %s1070_s0 = inlined_call_operand.vmem [shape: f32[256,8], index: 0, kind: input, shape index: {}]   ;;  %s1071_s1 = inlined_call_operand.vmem [shape: f32[30,8], index: 1, kind: output, shape index: {}]  }
   0x1   :  { %v11_v1 = vld [vmem:[%s1070_s0] sm:$0xff]  ;;  %v12_v2 = vld [vmem:[%s1070_s0 + $0x8] sm:$0xff]  ;;  %v13_v3 = vld [vmem:[%s1070_s0 + $0x10] sm:$0xff]  ;;  %v640_v29 = vsel %vm81_vm0, -3.4028235e+38, %v543_v28  ;;  %vm502_vm10 = vcmask 1041408  }
   0x2   :  { %v563_v4 = vshrl.u32 %v8_v0, 7  ;;  %v14_v5 = vld [vmem:[%s1070_s0 + $0x18] sm:$0xff]  ;;  %v15_v6 = vmax.f32 %v11_v1, %v13_v3  ;;  %v17_v7 = vld [vmem:[%s1070_s0 + $0x20] sm:$0xff]  ;;  %v18_v8 = vld [vmem:[%s1070_s0 + $0x28] sm:$0xff]  ;;  %vm504_vm11 = vcmask 1042432   ;;  %vm506_vm12 = vcmask 1043456  }
   0x3   :  { %v16_v9 = vmax.f32 %v12_v2, %v14_v5  ;;  %v21_v10 = vld [vmem:[%s1070_s0 + $0x30] sm:$0xff]  ;;  %v22_v12 = vld [vmem:[%s1070_s0 + $0x38] sm:$0xff]  ;;  %v583_v13 = vld [vmem:[%s1070_s0 + $0x40] sm:$0xff]  ;;  %vm508_vm13 = vcmask 1044480   ;;  %vm510_vm14 = vcmask 1045504   ;;  %vm512_vm15 = vcmask 1046528  }
   0x4   :  { %v19_v11 = vmax.f32 %v15_v6, %v17_v7  ;;  %v586_v14 = vadd.s32 8, %v563_v4  ;;  %v591_v16 = vld [vmem:[%s1070_s0 + $0x48] sm:$0xff]  ;;  %v596_v17 = vld [vmem:[%s1070_s0 + $0x50] sm:$0xff]  ;;  %v601_v18 = vld [vmem:[%s1070_s0 + $0x60] sm:$0xff]  ;;  %vm157_vm1 = vcmp.lt.s32.totalorder %v563_v4, 5  ;;  %vm173_vm2 = vcmp.ge.s32.totalorder %v563_v4, 5 }
   0x5   :  { %v20_v15 = vmax.f32 %v16_v9, %v18_v8  ;;  %v608_v20 = vld [vmem:[%s1070_s0 + $0x58] sm:$0xff]  ;;  %v613_v21 = vld [vmem:[%s1070_s0 + $0x68] sm:$0xff]  ;;  %v618_v22 = vld [vmem:[%s1070_s0 + $0x80] sm:$0xff]  ;;  %v207_v23 = vmax.f32 %v596_v17, %v601_v18  ;;  %vm296_vm5 = vcmp.lt.s32.totalorder %v563_v4, 4  ;;  %vm311_vm6 = vcmp.ge.s32.totalorder %v563_v4, 4 }
   0x6   :  { %v603_v19 = vmax.f32 %v19_v11, %v21_v10  ;;  %v627_v25 = vld [vmem:[%s1070_s0 + $0x88] sm:$0xff]  ;;  %v632_v26 = vld [vmem:[%s1070_s0 + $0x90] sm:$0xff]  ;;  %v637_v27 = vld [vmem:[%s1070_s0 + $0x98] sm:$0xff]  ;;  %v208_v30 = vmax.f32 %v608_v20, %v613_v21  ;;  %vm176_vm3 = vcmp.lt.s32.totalorder %v586_v14, 11  ;;  %vm192_vm4 = vcmp.ge.s32.totalorder %v586_v14, 11 }
   0x7   :  { %v622_v24 = vmax.f32 %v20_v15, %v22_v12  ;;  %v650_v32 = vld [vmem:[%s1070_s0 + $0x70] sm:$0xff]  ;;  %v121_v33 = vmax.f32 %v618_v22, %v632_v26  ;;  %v122_v34 = vmax.f32 %v627_v25, %v637_v27  ;;  %v662_v36 = vld [vmem:[%s1070_s0 + $0xa0] sm:$0xff]  ;;  %v667_v37 = vld [vmem:[%s1070_s0 + $0xa8] sm:$0xff]  ;;  %vm327_vm7 = vcmp.lt.s32.totalorder %v586_v14, 12 }
   0x8   :  { %v27_v31 = vmax.f32 %v603_v19, %v583_v13  ;;  %v672_v38 = vmax.f32 %v207_v23, %v650_v32  ;;  %v678_v40 = vld [vmem:[%s1070_s0 + $0x78] sm:$0xff]  ;;  %v688_v45 = vld [vmem:[%s1070_s0 + $0xb0] sm:$0xff]  ;;  %v713_v55 = vld [vmem:[%s1070_s0 + $0xc0] sm:$0xff]  ;;  %vm342_vm8 = vcmp.ge.s32.totalorder %v586_v14, 12 }
   0x9   :  { %v28_v35 = vmax.f32 %v622_v24, %v591_v16  ;;  %v123_v41 = vmax.f32 %v121_v33, %v662_v36  ;;  %v124_v42 = vmax.f32 %v122_v34, %v667_v37  ;;  %v693_v46 = vld [vmem:[%s1070_s0 + $0xb8] sm:$0xff]  ;;  %v699_v49 = vmax.f32 %v208_v30, %v678_v40  ;;  %v718_v56 = vld [vmem:[%s1070_s0 + $0xc8] sm:$0xff]  ;;  %v735_v1 = vld [vmem:[%s1070_s0 + $0xd0] sm:$0xff] }
   0xa   :  { %v31_v39 = vmax.f32 %v27_v31, %v596_v17  ;;  %v161_v43 = vsel %vm157_vm1, %v27_v31, -3.4028235e+38  ;;  %v179_v48 = vsel %vm173_vm2, %v27_v31, -3.4028235e+38  ;;  %v211_v59 = vmax.f32 %v672_v38, %v618_v22  ;;  %v740_v2 = vld [vmem:[%s1070_s0 + $0xd8] sm:$0xff]  ;;  %v755_v12 = vld [vmem:[%s1070_s0 + $0xe0] sm:$0xff] }
   0xb   :  { %v32_v44 = vmax.f32 %v28_v35, %v608_v20  ;;  %v163_v47 = vsel %vm81_vm0, %v161_v43, -inf  ;;  %v703_v51 = vmax.f32 %v123_v41, %v688_v45  ;;  %v706_v52 = vmax.f32 %v124_v42, %v693_v46  ;;  %v760_v15 = vld [vmem:[%s1070_s0 + $0xe8] sm:$0xff]  ;;  %v772_v41 = vld [vmem:[%s1070_s0 + $0xf0] sm:$0xff]  ;;  %v777_v42 = vld [vmem:[%s1070_s0 + $0xf8] sm:$0xff] }
   0xc   :  { %v35_v50 = vmax.f32 %v31_v39, %v601_v18  ;;  %v165_v53 = vmax.f32 %v163_v47, %v640_v29  ;;  %v180_v57 = vsel %vm176_vm3, %v28_v35, -3.4028235e+38  ;;  %v196_v58 = vsel %vm192_vm4, %v28_v35, -3.4028235e+38 }
   0xd   :  { %v36_v54 = vmax.f32 %v32_v44, %v613_v21  ;;  %v127_v61 = vmax.f32 %v703_v51, %v713_v55  ;;  %v128_v62 = vmax.f32 %v706_v52, %v718_v56  ;;  %v181_v3 = vsel %vm81_vm0, %v179_v48, -inf }
   0xe   :  { %v39_v60 = vmax.f32 %v35_v50, %v650_v32  ;;  %v166_v63 = vrot.slane %v165_v53, 4  ;;  %v182_v5 = vsel %vm81_vm0, %v180_v57, -inf  ;;  %v745_v6 = vsel %vm81_vm0, %v196_v58, -inf }
   0xf   :  { %v40_v0 = vmax.f32 %v36_v54, %v678_v40  ;;  %v129_v9 = vmax.f32 %v127_v61, %v735_v1  ;;  %v130_v10 = vmax.f32 %v128_v62, %v740_v2  ;;  %v183_v47 = vmax.f32 %v181_v3, %v182_v5 }
  0x10   :  { %v43_v7 = vmax.f32 %v39_v60, %v618_v22  ;;  %v97_v8 = vsel %vm81_vm0, %v39_v60, -inf  ;;  %v167_v30 = vmax.f32 %v165_v53, %v166_v63 }
  0x11   :  { %v44_v11 = vmax.f32 %v40_v0, %v627_v25  ;;  %v99_v23 = vmax.f32 %v97_v8, %v640_v29  ;;  %v113_v28 = vsel %vm81_vm0, %v40_v0, -inf  ;;  %v131_v34 = vmax.f32 %v129_v9, %v755_v12 }
  0x12   :  { %v47_v31 = vmax.f32 %v43_v7, %v632_v26  ;;  %v114_v33 = vmax.f32 %v640_v29, %v113_v28  ;;  %v132_v35 = vmax.f32 %v130_v10, %v760_v15  ;;  %v168_v44 = vrot.slane %v167_v30, 2 }
  0x13   :  { %v48_v39 = vmax.f32 %v44_v11, %v637_v27  ;;  %v100_v43 = vrot.slane %v99_v23, 4  ;;  %v133_v53 = vmax.f32 %v131_v34, %v772_v41  ;;  %v184_v61 = vrot.slane %v183_v47, 4 }
  0x14   :  { %v51_v48 = vmax.f32 %v47_v31, %v662_v36  ;;  %v115_v50 = vrot.slane %v114_v33, 4  ;;  %v134_v54 = vmax.f32 %v132_v35, %v777_v42  ;;  %v169_v60 = vmax.f32 %v167_v30, %v168_v44 }
  0x15   :  { %v52_v57 = vmax.f32 %v48_v39, %v667_v37  ;;  %v101_v58 = vmax.f32 %v99_v23, %v100_v43  ;;  %v137_v0 = vsel %vm81_vm0, %v133_v53, -inf  ;;  %v185_v28 = vmax.f32 %v183_v47, %v184_v61 }
  0x16   :  { %v55_v62 = vmax.f32 %v51_v48, %v688_v45  ;;  %v116_v63 = vmax.f32 %v114_v33, %v115_v50  ;;  %v149_v7 = vsel %vm81_vm0, %v134_v54, -inf  ;;  %v139_v8 = vmax.f32 %v137_v0, %v640_v29 }
  0x17   :  { %v56_v3 = vmax.f32 %v52_v57, %v693_v46  ;;  %v102_v5 = vrot.slane %v101_v58, 2  ;;  %v150_v9 = vmax.f32 %v640_v29, %v149_v7  ;;  %v170_v23 = vrot.slane %v169_v60, 1 }
  0x18   :  { %v59_v10 = vmax.f32 %v55_v62, %v713_v55  ;;  %v117_v11 = vrot.slane %v116_v63, 2  ;;  %v140_v33 = vrot.slane %v139_v8, 4  ;;  %v186_v44 = vrot.slane %v185_v28, 2 }
  0x19   :  { %v60_v30 = vmax.f32 %v56_v3, %v718_v56  ;;  %v103_v31 = vmax.f32 %v101_v58, %v102_v5  ;;  %v151_v34 = vrot.slane %v150_v9, 4  ;;  %v792_v43 = vmax.f32 %v169_v60, %v170_v23 }
  0x1a   :  { %v63_v35 = vmax.f32 %v59_v10, %v735_v1  ;;  %v118_v39 = vmax.f32 %v116_v63, %v117_v11  ;;  %v141_v53 = vmax.f32 %v139_v8, %v140_v33  ;;  %v187_v47 = vmax.f32 %v185_v28, %v186_v44 }
  0x1b   :  { %v64_v48 = vmax.f32 %v60_v30, %v740_v2  ;;  %v104_v50 = vrot.slane %v103_v31, 1  ;;  %v152_v54 = vmax.f32 %v150_v9, %v151_v34  ;;  %v212_v58 = vmax.f32 %v699_v49, %v627_v25 }
  0x1c   :  { %v67_v57 = vmax.f32 %v63_v35, %v755_v12  ;;  %v119_v62 = vrot.slane %v118_v39, 1  ;;  %v142_v0 = vrot.slane %v141_v53, 2  ;;  %v172_v60 = vmax.f32 %v792_v43, 0.0 }
  0x1d   :  { %v68_v61 = vmax.f32 %v64_v48, %v760_v15  ;;  %v153_v7 = vrot.slane %v152_v54, 2  ;;  %v801_v3 = vmax.f32 %v103_v31, %v104_v50  ;;  %v188_v5 = vrot.slane %v187_v47, 1 }
  0x1e   :  { %v71_v63 = vmax.f32 %v67_v57, %v772_v41  ;;  %v199_v8 = vmax.f32 %v640_v29, %v745_v6  ;;  %v143_v10 = vmax.f32 %v141_v53, %v142_v0  ;;  %v213_v25 = vmax.f32 %v211_v59, %v632_v26 }
  0x1f   :  { %v72_v9 = vmax.f32 %v68_v61, %v777_v42  ;;  %v154_v11 = vmax.f32 %v152_v54, %v153_v7  ;;  %v811_v23 = vmax.f32 %v187_v47, %v188_v5  ;;  %v214_v30 = vmax.f32 %v212_v58, %v637_v27 }
  0x20   :  { %v82_v49 = vsel %vm81_vm0, %v71_v63, -inf  ;;  %v200_v28 = vrot.slane %v199_v8, 4  ;;  %v815_v33 = vmax.f32 %v118_v39, %v119_v62  ;;  %v144_v6 = vrot.slane %v143_v10, 1 }
  0x21   :  { %v83_v31 = vsel %vm81_vm0, %v72_v9, -inf  ;;  %v215_v34 = vmax.f32 %v213_v25, %v662_v36  ;;  %v155_v44 = vrot.slane %v154_v11, 1  ;;  %v216_v22 = vmax.f32 %v214_v30, %v667_v37 }
  0x22   :  { %v84_v35 = vmax.f32 %v82_v49, %v83_v31  ;;  %v201_v48 = vmax.f32 %v199_v8, %v200_v28  ;;  %v819_v26 = vmax.f32 %v143_v10, %v144_v6  ;;  %v190_v38 = vmax.f32 %v811_v23, 0.0 }
  0x23   :  { %v217_v59 = vsel %vm157_vm1, %v215_v34, -3.4028235e+38  ;;  %v229_v27 = vsel %vm173_vm2, %v215_v34, -3.4028235e+38  ;;  %v230_v36 = vsel %vm176_vm3, %v216_v22, -3.4028235e+38  ;;  %v252_v5 = vmax.f32 %v688_v45, %v713_v55 }
  0x24   :  { %v85_v39 = vrot.slane %v84_v35, 4  ;;  %v202_v50 = vrot.slane %v201_v48, 2  ;;  %v219_v53 = vsel %vm81_vm0, %v217_v59, -inf  ;;  %v231_v37 = vsel %vm81_vm0, %v229_v27, -inf }
  0x25   :  { %v221_v54 = vmax.f32 %v219_v53, %v640_v29  ;;  %v232_v57 = vsel %vm81_vm0, %v230_v36, -inf  ;;  %v241_v62 = vsel %vm192_vm4, %v216_v22, -3.4028235e+38  ;;  %v253_v8 = vmax.f32 %v693_v46, %v718_v56 }
  0x26   :  { %v86_v47 = vmax.f32 %v84_v35, %v85_v39  ;;  %v203_v58 = vmax.f32 %v201_v48, %v202_v50  ;;  %v233_v61 = vmax.f32 %v231_v37, %v232_v57  ;;  %v243_v0 = vsel %vm81_vm0, %v241_v62, -inf }
  0x27   :  { %v222_v7 = vrot.slane %v221_v54, 4  ;;  %v244_v63 = vmax.f32 %v640_v29, %v243_v0  ;;  %v254_v30 = vmax.f32 %v252_v5, %v735_v1  ;;  %v255_v31 = vmax.f32 %v253_v8, %v740_v2 }
  0x28   :  { %v87_v9 = vrot.slane %v86_v47, 2  ;;  %v204_v10 = vrot.slane %v203_v58, 1  ;;  %v234_v25 = vrot.slane %v233_v61, 4  ;;  %v300_v45 = vsel %vm296_vm5, %v603_v19, -3.4028235e+38 }
  0x29   :  { %v223_v49 = vmax.f32 %v221_v54, %v222_v7  ;;  %v245_v28 = vrot.slane %v244_v63, 4  ;;  %v256_v22 = vmax.f32 %v254_v30, %v755_v12  ;;  %v257_v59 = vmax.f32 %v255_v31, %v760_v15 }
  0x2a   :  { %v88_v6 = vmax.f32 %v86_v47, %v87_v9  ;;  %v843_v34 = vmax.f32 %v203_v58, %v204_v10  ;;  %v235_v35 = vmax.f32 %v233_v61, %v234_v25  ;;  %v850_v39 = vmax.f32 %v154_v11, %v155_v44 }
  0x2b   :  { %v224_v46 = vrot.slane %v223_v49, 2  ;;  %v246_v48 = vmax.f32 %v244_v63, %v245_v28  ;;  %v302_v53 = vsel %vm81_vm0, %v300_v45, -inf  ;;  %v258_v37 = vmax.f32 %v256_v22, %v772_v41 }
  0x2c   :  { %v89_v27 = vrot.slane %v88_v6, 1  ;;  %v236_v50 = vrot.slane %v235_v35, 2  ;;  %v259_v57 = vmax.f32 %v257_v59, %v777_v42  ;;  %v206_v47 = vmax.f32 %v843_v34, 0.0 }
  0x2d   :  { %v225_v36 = vmax.f32 %v223_v49, %v224_v46  ;;  %v247_v54 = vrot.slane %v246_v48, 2  ;;  %v304_v61 = vmax.f32 %v302_v53, %v640_v29  ;;  %v260_v11 = vsel %vm157_vm1, %v258_v37, -3.4028235e+38 }
  0x2e   :  { %v855_v62 = vmax.f32 %v88_v6, %v89_v27  ;;  %v237_v58 = vmax.f32 %v235_v35, %v236_v50  ;;  %v272_v44 = vsel %vm173_vm2, %v258_v37, -3.4028235e+38  ;;  %v262_v5 = vsel %vm81_vm0, %v260_v11, -inf }
  0x2f   :  { %v226_v0 = vrot.slane %v225_v36, 1  ;;  %v248_v7 = vmax.f32 %v246_v48, %v247_v54  ;;  %v273_v8 = vsel %vm176_vm3, %v259_v57, -3.4028235e+38  ;;  %v274_v9 = vsel %vm81_vm0, %v272_v44, -inf }
  0x30   :  { %v238_v63 = vrot.slane %v237_v58, 1  ;;  %v264_v49 = vmax.f32 %v262_v5, %v640_v29  ;;  %v275_v28 = vsel %vm81_vm0, %v273_v8, -inf  ;;  %v285_v31 = vsel %vm192_vm4, %v259_v57, -3.4028235e+38 }
  0x31   :  { %v867_v10 = vmax.f32 %v225_v36, %v226_v0  ;;  %v249_v25 = vrot.slane %v248_v7, 1  ;;  %v276_v30 = vmax.f32 %v274_v9, %v275_v28  ;;  %v305_v6 = vrot.slane %v304_v61, 4 }
  0x32   :  { %v875_v45 = vmax.f32 %v237_v58, %v238_v63  ;;  %v265_v46 = vrot.slane %v264_v49, 4  ;;  %v287_v48 = vsel %vm81_vm0, %v285_v31, -inf  ;;  %v315_v50 = vsel %vm311_vm6, %v603_v19, -3.4028235e+38 }
  0x33   :  { %v228_v35 = vmax.f32 %v867_v10, 0.0  ;;  %v277_v22 = vrot.slane %v276_v30, 4  ;;  %v288_v59 = vmax.f32 %v640_v29, %v287_v48  ;;  %v306_v27 = vmax.f32 %v304_v61, %v305_v6 }
  0x34   :  { %v882_v53 = vmax.f32 %v248_v7, %v249_v25  ;;  %v266_v36 = vmax.f32 %v264_v49, %v265_v46  ;;  %v317_v54 = vsel %vm81_vm0, %v315_v50, -inf  ;;  %v331_v61 = vsel %vm327_vm7, %v622_v24, -3.4028235e+38 }
  0x35   :  { %v278_v37 = vmax.f32 %v276_v30, %v277_v22  ;;  %v289_v57 = vrot.slane %v288_v59, 4  ;;  %v307_v58 = vrot.slane %v306_v27, 2  ;;  %v319_v0 = vmax.f32 %v317_v54, %v640_v29 }
  0x36   :  { %v267_v11 = vrot.slane %v266_v36, 2  ;;  %v356_v19 = vmax.f32 %v583_v13, %v596_v17  ;;  %v333_v9 = vsel %vm81_vm0, %v331_v61, -inf  ;;  %v346_v25 = vsel %vm342_vm8, %v622_v24, -3.4028235e+38 }
  0x37   :  { %v279_v7 = vrot.slane %v278_v37, 2  ;;  %v290_v44 = vmax.f32 %v288_v59, %v289_v57  ;;  %v308_v63 = vmax.f32 %v306_v27, %v307_v58  ;;  %v320_v5 = vrot.slane %v319_v0, 4 }
  0x38   :  { %v268_v8 = vmax.f32 %v266_v36, %v267_v11  ;;  %v357_v49 = vmax.f32 %v591_v16, %v608_v20  ;;  %v334_v13 = vmax.f32 %v640_v29, %v333_v9  ;;  %v348_v17 = vsel %vm81_vm0, %v346_v25, -inf }
  0x39   :  { %v280_v28 = vmax.f32 %v278_v37, %v279_v7  ;;  %v291_v30 = vrot.slane %v290_v44, 2  ;;  %v309_v31 = vrot.slane %v308_v63, 1  ;;  %v321_v6 = vmax.f32 %v319_v0, %v320_v5 }
  0x3a   :  { %v269_v46 = vrot.slane %v268_v8, 1  ;;  %v358_v48 = vmax.f32 %v356_v19, %v601_v18  ;;  %v251_v22 = vmax.f32 %v882_v53, 0.0  ;;  %v335_v36 = vrot.slane %v334_v13, 4 }
  0x3b   :  { %v281_v59 = vrot.slane %v280_v28, 1  ;;  %v292_v27 = vmax.f32 %v290_v44, %v291_v30  ;;  %v322_v50 = vrot.slane %v321_v6, 2  ;;  %v349_v16 = vmax.f32 %v640_v29, %v348_v17 }
  0x3c   :  { %v903_v24 = vmax.f32 %v268_v8, %v269_v46  ;;  %v359_v20 = vmax.f32 %v357_v49, %v613_v21  ;;  %v360_v58 = vmax.f32 %v358_v48, %v650_v32  ;;  %v910_v0 = vmax.f32 %v308_v63, %v309_v31 }
  0x3d   :  { %v907_v54 = vmax.f32 %v280_v28, %v281_v59  ;;  %v293_v37 = vrot.slane %v292_v27, 1  ;;  %v323_v57 = vmax.f32 %v321_v6, %v322_v50  ;;  %v336_v18 = vmax.f32 %v334_v13, %v335_v36 }
  0x3e   :  { %v350_v11 = vrot.slane %v349_v16, 4  ;;  %v361_v61 = vmax.f32 %v359_v20, %v678_v40  ;;  %v271_v19 = vmax.f32 %v903_v24, 0.0  ;;  %v362_v21 = vsel %vm296_vm5, %v360_v58, -3.4028235e+38 }
  0x3f   :  { %v283_v7 = vmax.f32 %v907_v54, 0.0  ;;  %v915_v44 = vmax.f32 %v292_v27, %v293_v37  ;;  %v337_v5 = vrot.slane %v336_v18, 2  ;;  %v364_v9 = vsel %vm81_vm0, %v362_v21, -inf }
  0x40   :  { %v351_v8 = vmax.f32 %v349_v16, %v350_v11  ;;  %v373_v32 = vsel %vm311_vm6, %v360_v58, -3.4028235e+38  ;;  %v324_v25 = vrot.slane %v323_v57, 1  ;;  %v366_v40 = vmax.f32 %v364_v9, %v640_v29 }
  0x41   :  { %v375_v49 = vsel %vm81_vm0, %v373_v32, -inf  ;;  %v338_v28 = vmax.f32 %v336_v18, %v337_v5  ;;  %v385_v6 = vsel %vm327_vm7, %v361_v61, -3.4028235e+38  ;;  %v396_v17 = vsel %vm342_vm8, %v361_v61, -3.4028235e+38 }
  0x42   :  { %v352_v30 = vrot.slane %v351_v8, 2  ;;  %v377_v31 = vmax.f32 %v375_v49, %v640_v29  ;;  %v367_v46 = vrot.slane %v366_v40, 4  ;;  %v387_v13 = vsel %vm81_vm0, %v385_v6, -inf }
  0x43   :  { %v406_v48 = vsel %vm296_vm5, %v703_v51, -3.4028235e+38  ;;  %v339_v59 = vrot.slane %v338_v28, 1  ;;  %v388_v36 = vmax.f32 %v640_v29, %v387_v13  ;;  %v398_v20 = vsel %vm81_vm0, %v396_v17, -inf }
  0x44   :  { %v353_v27 = vmax.f32 %v351_v8, %v352_v30  ;;  %v378_v50 = vrot.slane %v377_v31, 4  ;;  %v368_v16 = vmax.f32 %v366_v40, %v367_v46  ;;  %v408_v37 = vsel %vm81_vm0, %v406_v48, -inf }
  0x45   :  { %v417_v58 = vsel %vm311_vm6, %v703_v51, -3.4028235e+38  ;;  %v940_v18 = vmax.f32 %v323_v57, %v324_v25  ;;  %v942_v11 = vmax.f32 %v338_v28, %v339_v59  ;;  %v389_v21 = vrot.slane %v388_v36, 4 }
  0x46   :  { %v379_v61 = vmax.f32 %v377_v31, %v378_v50  ;;  %v369_v5 = vrot.slane %v368_v16, 2  ;;  %v399_v8 = vmax.f32 %v640_v29, %v398_v20  ;;  %v410_v9 = vmax.f32 %v408_v37, %v640_v29 }
  0x47   :  { %v419_v32 = vsel %vm81_vm0, %v417_v58, -inf  ;;  %v354_v40 = vrot.slane %v353_v27, 1  ;;  %v390_v30 = vmax.f32 %v388_v36, %v389_v21  ;;  %v429_v25 = vsel %vm327_vm7, %v706_v52, -3.4028235e+38 }
  0x48   :  { %v380_v49 = vrot.slane %v379_v61, 2  ;;  %v421_v6 = vmax.f32 %v419_v32, %v640_v29  ;;  %v370_v46 = vmax.f32 %v368_v16, %v369_v5  ;;  %v400_v51 = vrot.slane %v399_v8, 4 }
  0x49   :  { %v411_v57 = vrot.slane %v410_v9, 4  ;;  %v391_v31 = vrot.slane %v390_v30, 2  ;;  %v431_v17 = vsel %vm81_vm0, %v429_v25, -inf  ;;  %v440_v16 = vsel %vm342_vm8, %v706_v52, -3.4028235e+38 }
  0x4a   :  { %v381_v28 = vmax.f32 %v379_v61, %v380_v49  ;;  %v422_v13 = vrot.slane %v421_v6, 4  ;;  %v371_v48 = vrot.slane %v370_v46, 1  ;;  %v401_v59 = vmax.f32 %v399_v8, %v400_v51 }
  0x4b   :  { %v412_v50 = vmax.f32 %v410_v9, %v411_v57  ;;  %v432_v20 = vmax.f32 %v640_v29, %v431_v17  ;;  %v392_v37 = vmax.f32 %v390_v30, %v391_v31  ;;  %v956_v21 = vmax.f32 %v353_v27, %v354_v40 }
  0x4c   :  { %v382_v36 = vrot.slane %v381_v28, 1  ;;  %v423_v58 = vmax.f32 %v421_v6, %v422_v13  ;;  %v402_v5 = vrot.slane %v401_v59, 2  ;;  %v958_v49 = vmax.f32 %v370_v46, %v371_v48 }
  0x4d   :  { %v413_v61 = vrot.slane %v412_v50, 2  ;;  %v433_v32 = vrot.slane %v432_v20, 4  ;;  %v393_v25 = vrot.slane %v392_v37, 1  ;;  %v442_v8 = vsel %vm81_vm0, %v440_v16, -inf }
  0x4e   :  { %v424_v63 = vrot.slane %v423_v58, 2  ;;  %v403_v9 = vmax.f32 %v401_v59, %v402_v5  ;;  %v443_v30 = vmax.f32 %v640_v29, %v442_v8  ;;  %v962_v6 = vmax.f32 %v381_v28, %v382_v36 }
  0x4f   :  { %v414_v51 = vmax.f32 %v412_v50, %v413_v61  ;;  %v434_v57 = vmax.f32 %v432_v20, %v433_v32  ;;  %v450_v52 = vmax.f32 %v713_v55, %v735_v1  ;;  %v451_v27 = vmax.f32 %v718_v56, %v740_v2 }
  0x50   :  { %v964_v31 = vmax.f32 %v423_v58, %v424_v63  ;;  %v404_v40 = vrot.slane %v403_v9, 1  ;;  %v444_v17 = vrot.slane %v443_v30, 4  ;;  %v970_v48 = vmax.f32 %v392_v37, %v393_v25 }
  0x51   :  { %v415_v46 = vrot.slane %v414_v51, 1  ;;  %v435_v13 = vrot.slane %v434_v57, 2  ;;  %v452_v59 = vmax.f32 %v450_v52, %v755_v12  ;;  %v453_v50 = vmax.f32 %v451_v27, %v760_v15 }
  0x52   :  { %v974_v28 = vmax.f32 %v403_v9, %v404_v40  ;;  %v426_v63 = vrot.slane %v964_v31, 1  ;;  %v445_v55 = vmax.f32 %v443_v30, %v444_v17  ;;  %v501_v36 = vsel %vm500_vm9, %v855_v62, %v801_v3 }
  0x53   :  { %v436_v20 = vmax.f32 %v434_v57, %v435_v13  ;;  %v977_v1 = vmax.f32 %v414_v51, %v415_v46  ;;  %v454_v56 = vmax.f32 %v452_v59, %v772_v41  ;;  %v455_v2 = vmax.f32 %v453_v50, %v777_v42 }
  0x54   :  { %v446_v37 = vrot.slane %v445_v55, 2  ;;  %v503_v41 = vsel %vm502_vm10, %v501_v36, %v815_v33  ;;  %v521_v10 = vsel %vm500_vm9, %v942_v11, %v956_v21  ;;  %vm536_vm1 = vcmask 62464  }
  0x55   :  { %v437_v12 = vrot.slane %v436_v20, 1  ;;  %v456_v15 = vsel %vm296_vm5, %v454_v56, -3.4028235e+38  ;;  %v467_v58 = vsel %vm311_vm6, %v454_v56, -3.4028235e+38  ;;  %v505_v51 = vsel %vm504_vm11, %v503_v41, %v819_v26 }
  0x56   :  { %v479_v16 = vsel %vm327_vm7, %v455_v2, -3.4028235e+38  ;;  %v447_v5 = vmax.f32 %v445_v55, %v446_v37  ;;  %v458_v3 = vsel %vm81_vm0, %v456_v15, -inf  ;;  %v469_v62 = vsel %vm81_vm0, %v467_v58, -inf }
  0x57   :  { %v438_v42 = vmax.f32 %v436_v20, %v437_v12  ;;  %v460_v61 = vmax.f32 %v458_v3, %v640_v29  ;;  %v471_v32 = vmax.f32 %v469_v62, %v640_v29  ;;  %v481_v25 = vsel %vm81_vm0, %v479_v16, -inf }
  0x58   :  { %v490_v4 = vsel %vm342_vm8, %v455_v2, -3.4028235e+38  ;;  %v448_v8 = vrot.slane %v447_v5, 1  ;;  %v482_v9 = vmax.f32 %v640_v29, %v481_v25  ;;  %v507_v46 = vsel %vm506_vm12, %v505_v51, %v850_v39 }
  0x59   :  { %v492_v33 = vsel %vm81_vm0, %v490_v4, -inf  ;;  %v461_v57 = vrot.slane %v460_v61, 4  ;;  %v472_v30 = vrot.slane %v471_v32, 4  ;;  %v509_v59 = vsel %vm508_vm13, %v507_v46, %v172_v60 }
  0x5a   :  { %v493_v52 = vmax.f32 %v640_v29, %v492_v33  ;;  %v449_v27 = vmax.f32 %v447_v5, %v448_v8  ;;  %v483_v40 = vrot.slane %v482_v9, 4  ;;  %v514_v29 = vsel %vm500_vm9, %v228_v35, %v875_v45 }
  0x5b   :  { %v462_v14 = vmax.f32 %v460_v61, %v461_v57  ;;  %v473_v13 = vmax.f32 %v471_v32, %v472_v30  ;;  %v511_v39 = vsel %vm510_vm14, %v509_v59, %v190_v38  ;;  %v515_v60 = vsel %vm502_vm10, %v514_v29, %v251_v22 }
  0x5c   :  { %v494_v17 = vrot.slane %v493_v52, 4  ;;  %v484_v50 = vmax.f32 %v482_v9, %v483_v40  ;;  %v513_v43 = vsel %vm512_vm15, %v511_v39, %v206_v47  ;;  %v516_v23 = vsel %vm504_vm11, %v515_v60, %v271_v19 }
  0x5d   :  { %v463_v26 = vrot.slane %v462_v14, 2  ;;  %v474_v20 = vrot.slane %v473_v13, 2  ;;  %533 = vst.msk [vmem:[%s1071_s1] sm:$0xff] %vm81_vm0, %v513_v43  ;;  %v427_v38 = vmax.f32 %v964_v31, %v426_v63  ;;  %v517_v47 = vsel %vm506_vm12, %v516_v23, %v283_v7 }
  0x5e   :  { %v495_v55 = vmax.f32 %v493_v52, %v494_v17  ;;  %v485_v56 = vrot.slane %v484_v50, 2  ;;  %v522_v53 = vsel %vm502_vm10, %v521_v10, %v958_v49  ;;  %v1072_v19 = vmax.f32 %v915_v44, 0.0 }
  0x5f   :  { %v464_v35 = vmax.f32 %v462_v14, %v463_v26  ;;  %v475_v45 = vmax.f32 %v473_v13, %v474_v20  ;;  %v523_v31 = vsel %vm504_vm11, %v522_v53, %v962_v6  ;;  %v528_v54 = vsel %vm500_vm9, %v438_v42, %v449_v27 }
  0x60   :  { %v496_v2 = vrot.slane %v495_v55, 2  ;;  %v486_v34 = vmax.f32 %v484_v50, %v485_v56  ;;  %v518_v21 = vsel %vm508_vm13, %v517_v47, %v1072_v19  ;;  %v524_v44 = vsel %vm506_vm12, %v523_v31, %v970_v48 }
  0x61   :  { %v465_v22 = vrot.slane %v464_v35, 1  ;;  %v476_v11 = vrot.slane %v475_v45, 1  ;;  %v519_v12 = vsel %vm510_vm14, %v518_v21, %v910_v0  ;;  %v525_v6 = vsel %vm508_vm13, %v524_v44, %v974_v28 }
  0x62   :  { %v497_v24 = vmax.f32 %v495_v55, %v496_v2  ;;  %v487_v36 = vrot.slane %v486_v34, 1  ;;  %v520_v49 = vsel %vm512_vm15, %v519_v12, %v940_v18  ;;  %v526_v16 = vsel %vm510_vm14, %v525_v6, %v977_v1 }
  0x63   :  { %v466_v7 = vmax.f32 %v464_v35, %v465_v22  ;;  %v477_v63 = vmax.f32 %v475_v45, %v476_v11  ;;  %534 = vst.msk [vmem:[%s1071_s1 + $0x8] sm:$0xff] %vm81_vm0, %v520_v49  ;;  %v527_v41 = vsel %vm512_vm15, %v526_v16, %v427_v38 }
  0x64   :  { %v498_v37 = vrot.slane %v497_v24, 1  ;;  %v488_v15 = vmax.f32 %v486_v34, %v487_v36  ;;  %535 = vst.msk [vmem:[%s1071_s1 + $0x10] sm:$0xff] %vm81_vm0, %v527_v41 }
  0x65   :  { %v529_v58 = vsel %vm502_vm10, %v528_v54, %v466_v7 }
  0x66   :  { %v499_v0 = vmax.f32 %v497_v24, %v498_v37  ;;  %v530_v18 = vsel %vm504_vm11, %v529_v58, %v477_v63 }
  0x67   :  { %v531_v48 = vsel %vm506_vm12, %v530_v18, %v488_v15 }
  0x68   :  { %v532_v42 = vsel %vm508_vm13, %v531_v48, %v499_v0 }
  0x69   :  { %537 = vst.msk [vmem:[%s1071_s1 + $0x18] sm:$0x3f] %vm536_vm1, %v532_v42 }

</bundles_post_ra>
